<compile_context>
chip_gen: v6e
topology: v6e:2x2x1
jax: 0.10.0
libtpu: 0.0.40
codegen_flags: <defaults>
</compile_context>

<pallas_src>
import jax
import jax.numpy as jnp
from jax.experimental import pallas as pl
from jax.experimental.pallas import tpu as pltpu

# ---- problem sizes (small, consistent with the module) ----
B = 2        # batch
T = 8        # caption length
E = 16       # embed_dim
H = 32       # hidden_dim
K = 49       # spatial locations (7x7)
A = 49       # attention projection dim (hard-coded 49 in the module)
VOCAB = 64   # vocab_sz
C = 128      # stand-in channel count for the ResNet feature map (2048 in the paper)
LANE = 128   # TPU lane width; each gate gets its own lane block


def _use_bf16_attention():
    """bf16 VPU/EUP exist on v6e/v7x; v5e (and older) lack them -> keep f32."""
    try:
        dev = jax.devices()[0]
        if dev.platform != "tpu":
            return False
        kind = dev.device_kind.lower()
    except Exception:
        return False
    return any(tag in kind for tag in ("v6", "v7", "7x"))


# ======================================================================
# encoderCNN head: 7x7 avg-pool + feature_i / feature_g Linears + ReLU
# ======================================================================
def encoder_head_kernel(a_ref, wi_ref, bi_ref, wg_ref, bg_ref, v_ref, vg_ref):
    a = a_ref[...]                                                    # (B, K, C)
    # feature_i on every spatial location: (B*K, C) @ (C, H) + ReLU
    vi = jnp.dot(a.reshape(B * K, C), wi_ref[...],
                 preferred_element_type=jnp.float32).reshape(B, K, H)
    v_ref[...] = jnp.maximum(vi + bi_ref[...], 0.0)
    # AvgPool2d(7) over the 7x7 map == mean over the K locations
    a_g = jnp.mean(a, axis=1)                                         # (B, C)
    vg_ref[...] = jnp.maximum(
        jnp.dot(a_g, wg_ref[...], preferred_element_type=jnp.float32) + bg_ref[...],
        0.0)


def encoder_head_forward(A_feat, p):
    vmem = pl.BlockSpec(memory_space=pltpu.MemorySpace.VMEM)
    V, v_g = pl.pallas_call(
        encoder_head_kernel,
        out_shape=(jax.ShapeDtypeStruct((B, K, H), jnp.float32),
                   jax.ShapeDtypeStruct((B, E), jnp.float32)),
        in_specs=[vmem] * 5,
        out_specs=(vmem, vmem),
    )(A_feat.astype(jnp.float32),
      p["fi_w"].T.astype(jnp.float32), p["fi_b"].reshape(1, 1, H),
      p["fg_w"].T.astype(jnp.float32), p["fg_b"].reshape(1, E))
    return V, v_g


def encoder_head_reference(A_feat, p):
    a = A_feat.astype(jnp.float32)
    V = jax.nn.relu(a @ p["fi_w"].T + p["fi_b"])
    a_g = jnp.mean(a, axis=1)
    v_g = jax.nn.relu(a_g @ p["fg_w"].T + p["fg_b"])
    return V, v_g


# ======================================================================
# decoderLSTM forward
# ======================================================================
def decoder_kernel(x_ref, v_ref, vp_ref, w_ref, vec_ref, preds_ref):
    f32 = jnp.float32
    attn_dt = vp_ref.dtype

    # ---- unpack fused weights (static, 128-lane-aligned slices) ----
    w_x_gates = w_ref[:, 0:5 * LANE]                     # (2E, 640)  x-side gate weights
    w_h_fused = w_ref[:, 5 * LANE:11 * LANE]             # (H, 768)   [W_hh | W_h | W_g]
    w_mlp     = w_ref[:, 11 * LANE:11 * LANE + VOCAB]    # (H, VOCAB)
    b_gates   = vec_ref[:, 0:5 * LANE]                   # (1, 640)
    w_ha_b    = vec_ref[:, 5 * LANE:5 * LANE + A].astype(attn_dt).reshape(1, 1, A)
    b_mlp     = vec_ref[:, 6 * LANE:6 * LANE + VOCAB]    # (1, VOCAB)

    # ---- x-side gate GEMM hoisted out of the recurrence (one matmul) ----
    xw = jnp.dot(x_ref[...], w_x_gates, preferred_element_type=f32) + b_gates  # (T*B, 640)

    # ---- serial recurrence: exactly one matmul per step ----
    hw = jnp.zeros((B, 6 * LANE), f32)   # dot(h_prev, [W_hh|W_h|W_g]); h0 == 0
    c = jnp.zeros((B, H), f32)
    rows = []
    for t in range(T):                   # static unroll (was fori_loop(unroll=True))
        xh = xw[t * B:(t + 1) * B, :] + hw[:, :5 * LANE]              # (B, 640)
        i_g = jax.nn.sigmoid(xh[:, 0 * LANE:0 * LANE + H])
        f_g = jax.nn.sigmoid(xh[:, 1 * LANE:1 * LANE + H])
        g_g = jnp.tanh(      xh[:, 2 * LANE:2 * LANE + H])
        o_g = jax.nn.sigmoid(xh[:, 3 * LANE:3 * LANE + H])
        s_g = jax.nn.sigmoid(xh[:, 4 * LANE:4 * LANE + H])            # sentinel gate
        c = f_g * c + i_g * g_g
        tanh_c = jnp.tanh(c)
        h = o_g * tanh_c                                              # (B, H)
        s_t = s_g * tanh_c

        # fused h-side matmul: next step's gate contribution + this step's W_g h
        hw = jnp.dot(h, w_h_fused, preferred_element_type=f32)        # (B, 768)
        gh = hw[:, 5 * LANE:5 * LANE + A]                             # (B, A)

        # ---- adaptive attention (V/Vp read per step; bf16 path on v6e/v7x) ----
        z = jnp.tanh(vp_ref[...] + gh.astype(attn_dt)[:, None, :])    # (B, K, A)
        zt = jnp.sum(z * w_ha_b, axis=-1).astype(f32)                 # (B, K)
        zt_max = jnp.max(zt, axis=-1, keepdims=True)
        e = jnp.exp(zt - zt_max)
        alpha = e / jnp.sum(e, axis=-1, keepdims=True)                # exact divide
        c_att = jnp.einsum(
            "bqk,bkh->bqh", alpha.astype(attn_dt)[:, None, :], v_ref[...],
            preferred_element_type=f32)[:, 0, :]                      # (B, H)
        beta = alpha[:, K - 1:K]
        rows.append(beta * s_t + (1.0 - beta) * c_att + h)
        # NOTE: the module's hat_alpha / W_s path never reaches the output -> omitted.

    # ---- one output GEMM for all timesteps + one store ----
    hat = jnp.concatenate(rows, axis=0)                               # (T*B, H)
    preds_ref[...] = jnp.dot(hat, w_mlp, preferred_element_type=f32) + b_mlp


def _lane_block(w, width=LANE):
    """Place a (rows, n<=width) matrix at the start of its own lane block."""
    rows, n = w.shape
    return jnp.pad(w.astype(jnp.float32), ((0, 0), (0, width - n)))


def pack_decoder_params(p):
    """Fuse + lane-pad all decoder weights into one matrix and one vector.

    w_pack  (2E==H, 1472): [0,640) x-side gates (gate g at [g*128, g*128+H)),
                           [640,1408) h-side fused [W_hh | W_h | W_g],
                           [1408,1472) output-MLP weight.
    vec_pack (1, 832):     [0,640) fused gate bias (b_ih+b_hh; sentinel zero),
                           [640,768) attention w_ha, [768,832) MLP bias.
    """
    assert 2 * E == H, "packing below relies on 2E == H (row counts must match)"
    wx_blocks = [_lane_block(p["w_ih"][g * H:(g + 1) * H, :].T) for g in range(4)]
    wx_blocks.append(_lane_block(p["w_x"].T))
    wh_blocks = [_lane_block(p["w_hh"][g * H:(g + 1) * H, :].T) for g in range(4)]
    wh_blocks.append(_lane_block(p["w_h"].T))
    wh_blocks.append(_lane_block(p["w_g"].T))                    # attention W_g (H -> A)
    w_pack = jnp.concatenate(
        wx_blocks + wh_blocks + [p["w_mlp"].T.astype(jnp.float32)], axis=1)

    b_blocks = [
        _lane_block((p["b_ih"][g * H:(g + 1) * H]
                     + p["b_hh"][g * H:(g + 1) * H]).reshape(1, H))
        for g in range(4)
    ]
    b_blocks.append(jnp.zeros((1, LANE), jnp.float32))           # sentinel: no bias
    b_blocks.append(_lane_block(p["w_ha"].reshape(1, A)))
    vec_pack = jnp.concatenate(
        b_blocks + [p["b_mlp"].reshape(1, VOCAB).astype(jnp.float32)], axis=1)
    return w_pack, vec_pack


def decoder_lstm_forward(V_feat, v_g, caption, p):
    """Full decoderLSTM forward.  Returns logits of shape (B, T, VOCAB)."""
    attn_dtype = jnp.bfloat16 if _use_bf16_attention() else jnp.float32

    # glue: embedding lookup + concat with broadcast v_g (pure JAX)
    w = p["emb"][caption]                                              # (B, T, E)
    x = jnp.concatenate([w, jnp.broadcast_to(v_g[:, None, :], w.shape)], axis=-1)
    x_flat = jnp.transpose(x, (1, 0, 2)).reshape(T * B, 2 * E).astype(jnp.float32)

    V_f32 = V_feat.astype(jnp.float32)
    Vp = jnp.einsum("bkh,ah->bka", V_f32, p["w_v"])                    # hoisted W_v(V)

    w_pack, vec_pack = pack_decoder_params(p)

    vmem = pl.BlockSpec(memory_space=pltpu.MemorySpace.VMEM)
    preds_flat = pl.pallas_call(
        decoder_kernel,
        out_shape=jax.ShapeDtypeStruct((T * B, VOCAB), jnp.float32),
        in_specs=[vmem] * 5,
        out_specs=vmem,
    )(x_flat, V_f32.astype(attn_dtype), Vp.astype(attn_dtype), w_pack, vec_pack)

    # row index = t*B + b  ->  (T, B, VOCAB) -> (B, T, VOCAB)
    return jnp.transpose(preds_flat.reshape(T, B, VOCAB), (1, 0, 2))


def reference_decoder_forward(V_feat, v_g, caption, p):
    """Pure-JAX mirror of the PyTorch decoderLSTM forward (for validation)."""
    w = p["emb"][caption]
    x = jnp.concatenate([w, jnp.broadcast_to(v_g[:, None, :], w.shape)], axis=-1)
    h = jnp.zeros((B, H), jnp.float32)
    c = jnp.zeros((B, H), jnp.float32)
    preds = []
    for t in range(T):
        xt = x[:, t, :]
        gates = xt @ p["w_ih"].T + p["b_ih"] + h @ p["w_hh"].T + p["b_hh"]
        i = jax.nn.sigmoid(gates[:, :H])
        f = jax.nn.sigmoid(gates[:, H:2 * H])
        g = jnp.tanh(gates[:, 2 * H:3 * H])
        o = jax.nn.sigmoid(gates[:, 3 * H:])
        c_new = f * c + i * g
        h_new = o * jnp.tanh(c_new)
        g_t = jax.nn.sigmoid(xt @ p["w_x"].T + h @ p["w_h"].T)
        s_t = g_t * jnp.tanh(c_new)
        Vp = V_feat @ p["w_v"].T
        gh = h_new @ p["w_g"].T
        z = jnp.tanh(Vp + gh[:, None, :])
        zt = (z @ p["w_ha"].T)[..., 0]
        alpha = jax.nn.softmax(zt, axis=-1)
        c_att = jnp.einsum("bk,bkh->bh", alpha, V_feat)
        beta = alpha[:, -1:]
        hat_c = beta * s_t + (1.0 - beta) * c_att
        preds.append((hat_c + h_new) @ p["w_mlp"].T + p["b_mlp"])
        h, c = h_new, c_new
    return jnp.stack(preds, axis=1)


def make_decoder_params(key):
    ks = jax.random.split(key, 12)
    n = lambda k, shape: (0.1 * jax.random.normal(k, shape)).astype(jnp.float32)
    return {
        "emb": n(ks[0], (VOCAB, E)),
        "w_ih": n(ks[1], (4 * H, 2 * E)),
        "w_hh": n(ks[2], (4 * H, H)),
        "b_ih": n(ks[3], (4 * H,)),
        "b_hh": n(ks[4], (4 * H,)),
        "w_x": n(ks[5], (H, 2 * E)),
        "w_h": n(ks[6], (H, H)),
        "w_v": n(ks[7], (A, H)),
        "w_g": n(ks[8], (A, H)),
        "w_ha": n(ks[9], (1, A)),
        # W_s exists in the module but only feeds dead code (hat_alpha); unused.
        "w_mlp": n(ks[10], (VOCAB, H)),
        "b_mlp": n(ks[11], (VOCAB,)),
    }


def make_encoder_params(key):
    ks = jax.random.split(key, 4)
    n = lambda k, shape: (0.1 * jax.random.normal(k, shape)).astype(jnp.float32)
    return {
        "fi_w": n(ks[0], (H, C)), "fi_b": n(ks[1], (H,)),
        "fg_w": n(ks[2], (E, C)), "fg_b": n(ks[3], (E,)),
    }


if __name__ == "__main__":
    key = jax.random.PRNGKey(0)
    k_enc, k_dec, k_a, k_c = jax.random.split(key, 4)
    enc_p = make_encoder_params(k_enc)
    dec_p = make_decoder_params(k_dec)

    # stand-in for the ResNet-152 conv feature map, already in (B, 7*7, C) layout
    A_feat = (0.5 * jax.random.normal(k_a, (B, K, C))).astype(jnp.float32)
    caption = jax.random.randint(k_c, (B, T), 0, VOCAB, dtype=jnp.int32)

    # encoderCNN head (avg-pool + feature_i / feature_g + ReLU) in Pallas
    V_feat, v_g = encoder_head_forward(A_feat, enc_p)
    V_feat = jax.block_until_ready(V_feat)
    V_r, vg_r = encoder_head_reference(A_feat, enc_p)
    assert jnp.allclose(V_feat, V_r, atol=1e-4, rtol=1e-4)
    assert jnp.allclose(v_g, vg_r, atol=1e-4, rtol=1e-4)

    # decoderLSTM forward in Pallas
    preds = decoder_lstm_forward(V_feat, v_g, caption, dec_p)
    preds = jax.block_until_ready(preds)
    ref = reference_decoder_forward(V_feat, v_g, caption, dec_p)
    assert preds.shape == (B, T, VOCAB)
    # f32 everywhere on v5e (exact-divide softmax -> tight bound); the attention
    # path is bf16 on v6e/v7x, hence the looser bound there.
    tol = 3e-2 if _use_bf16_attention() else 1e-3
    err = float(jnp.max(jnp.abs(preds - ref)))
    assert jnp.allclose(preds, ref, atol=tol, rtol=tol), err
    print("KERNEL_OK")
</pallas_src>

<mosaic_0001>
module attributes {stable_mosaic.version = 11 : i64} {
  func.func @encoder_head_kernel(%arg0: memref<2x49x128xf32, #tpu.memory_space<vmem>>, %arg1: memref<128x32xf32, #tpu.memory_space<vmem>>, %arg2: memref<1x1x32xf32, #tpu.memory_space<vmem>>, %arg3: memref<128x16xf32, #tpu.memory_space<vmem>>, %arg4: memref<1x16xf32, #tpu.memory_space<vmem>>, %arg5: memref<2x49x32xf32, #tpu.memory_space<vmem>>, %arg6: memref<2x16xf32, #tpu.memory_space<vmem>>) attributes {dimension_semantics = [], scalar_prefetch = 0 : i64, scratch_operands = 0 : i64, tpu.core_type = #tpu.core_type<tc>} {
    %c0 = arith.constant 0 : index
    %c0_0 = arith.constant 0 : index
    %c0_1 = arith.constant 0 : index
    %0 = vector.load %arg0[%c0, %c0_0, %c0_1] : memref<2x49x128xf32, #tpu.memory_space<vmem>>, vector<2x49x128xf32>
    %1 = vector.shape_cast %0 : vector<2x49x128xf32> to vector<98x128xf32>
    %c0_2 = arith.constant 0 : index
    %c0_3 = arith.constant 0 : index
    %2 = vector.load %arg1[%c0_2, %c0_3] : memref<128x32xf32, #tpu.memory_space<vmem>>, vector<128x32xf32>
    %cst = arith.constant dense<0.000000e+00> : vector<98x32xf32>
    %3 = tpu.matmul %1, %2, %cst {dimension_numbers = #tpu.dot_dimension_numbers<[1], [0], [0], [1], [0, 0, 1, 1], [], []>} : vector<98x128xf32>, vector<128x32xf32>, vector<98x32xf32> -> vector<98x32xf32>
    %4 = vector.shape_cast %3 : vector<98x32xf32> to vector<2x49x32xf32>
    %c0_4 = arith.constant 0 : index
    %c0_5 = arith.constant 0 : index
    %c0_6 = arith.constant 0 : index
    %5 = vector.load %arg2[%c0_4, %c0_5, %c0_6] : memref<1x1x32xf32, #tpu.memory_space<vmem>>, vector<1x1x32xf32>
    %6 = vector.broadcast %5 : vector<1x1x32xf32> to vector<2x49x32xf32>
    %7 = arith.addf %4, %6 : vector<2x49x32xf32>
    %cst_7 = arith.constant 0.000000e+00 : f32
    %8 = vector.broadcast %cst_7 : f32 to vector<2x49x32xf32>
    %9 = arith.maximumf %7, %8 : vector<2x49x32xf32>
    %c0_8 = arith.constant 0 : index
    %c0_9 = arith.constant 0 : index
    %c0_10 = arith.constant 0 : index
    %10 = vector.load %arg5[%c0_8, %c0_9, %c0_10] : memref<2x49x32xf32, #tpu.memory_space<vmem>>, vector<2x49x32xf32>
    tpu.vector_store %arg5[%c0_8, %c0_9, %c0_10], %9 {strides = array<i32>} : memref<2x49x32xf32, #tpu.memory_space<vmem>>, vector<2x49x32xf32>,
    %cst_11 = arith.constant dense<0.000000e+00> : vector<2x128xf32>
    %11 = vector.multi_reduction <add>, %0, %cst_11 [1] : vector<2x49x128xf32> to vector<2x128xf32>
    %cst_12 = arith.constant 4.900000e+01 : f32
    %12 = vector.broadcast %cst_12 : f32 to vector<2x128xf32>
    %13 = arith.divf %11, %12 : vector<2x128xf32>
    %c0_13 = arith.constant 0 : index
    %c0_14 = arith.constant 0 : index
    %14 = vector.load %arg3[%c0_13, %c0_14] : memref<128x16xf32, #tpu.memory_space<vmem>>, vector<128x16xf32>
    %cst_15 = arith.constant dense<0.000000e+00> : vector<2x16xf32>
    %15 = tpu.matmul %13, %14, %cst_15 {dimension_numbers = #tpu.dot_dimension_numbers<[1], [0], [0], [1], [0, 0, 1, 1], [], []>} : vector<2x128xf32>, vector<128x16xf32>, vector<2x16xf32> -> vector<2x16xf32>
    %c0_16 = arith.constant 0 : index
    %c0_17 = arith.constant 0 : index
    %16 = vector.load %arg4[%c0_16, %c0_17] : memref<1x16xf32, #tpu.memory_space<vmem>>, vector<1x16xf32>
    %17 = vector.broadcast %16 : vector<1x16xf32> to vector<2x16xf32>
    %18 = arith.addf %15, %17 : vector<2x16xf32>
    %cst_18 = arith.constant 0.000000e+00 : f32
    %19 = vector.broadcast %cst_18 : f32 to vector<2x16xf32>
    %20 = arith.maximumf %18, %19 : vector<2x16xf32>
    %c0_19 = arith.constant 0 : index
    %c0_20 = arith.constant 0 : index
    %21 = vector.load %arg6[%c0_19, %c0_20] : memref<2x16xf32, #tpu.memory_space<vmem>>, vector<2x16xf32>
    tpu.vector_store %arg6[%c0_19, %c0_20], %20 {strides = array<i32>} : memref<2x16xf32, #tpu.memory_space<vmem>>, vector<2x16xf32>,
    return
  }
}

</mosaic_0001>

<bundles_post_ra>
// kernel: tpu_custom_call.1
= control target key start
LH: loop header
LB: loop body
LE: loop exit
PB: predicated region body
PF: predicated region fallthrough
CT: control target
= control target key end

     0   :  { %v55_v1 = vlaneseq  ;;  %v3506_v2 = vmov 0.0   ;;  %vm3507_vm0 = vmmov 0   ;;  %v3508_v4 = vmov 1966171168   ;;  %s4397_s0 = inlined_call_operand.vmem [shape: f32[2,49,128], index: 0, kind: input, shape index: {}]   ;;  %s4398_s1 = inlined_call_operand.vmem [shape: f32[128,32], index: 1, kind: input, shape index: {}]   ;;  %s4399_s2 = inlined_call_operand.vmem [shape: f32[1,1,32], index: 2, kind: input, shape index: {}]   ;;  %s4400_s3 = inlined_call_operand.vmem [shape: f32[128,16], index: 3, kind: input, shape index: {}]   ;;  %s4401_s4 = inlined_call_operand.vmem [shape: f32[1,16], index: 4, kind: input, shape index: {}]   ;;  %s4402_s5 = inlined_call_operand.vmem [shape: f32[2,49,32], index: 5, kind: output, shape index: {0}]   ;;  %s4403_s6 = inlined_call_operand.hbm [shape: f32[2,16], index: 6, kind: output, shape index: {1}]  }
   0x1   :  { %v682_v0 = vld [vmem:[%s4398_s1 + $0x78] sm:$0xff]  ;;  %3362 = vmatprep.subr.mxu0 %v3506_v2  ;;  %v681_v3 = vld [vmem:[%s4398_s1 + $0x70] sm:$0xff]  ;;  %3394 = vmatprep.mubr.msk.f32.mxu0 %vm3507_vm0, %v3506_v2  ;;  %v53_v5 = vunpack.c.l.s4 %v3508_v4  ;;  %v680_v7 = vld [vmem:[%s4398_s1 + $0x68] sm:$0xff] }
   0x2   :  { %3363 = vmatpush3.msra.mxu0 %v682_v0  ;;  %v56_v6 = vshrl.u32 %v55_v1, 7  ;;  %3433 = vmatprep.subr.mxu1 %v3506_v2  ;;  %v679_v9 = vld [vmem:[%s4398_s1 + $0x60] sm:$0xff]  ;;  %v24_v11 = vld [vmem:[%s4397_s0 + $0x8] sm:$0xff]  ;;  %v25_v16 = vld [vmem:[%s4397_s0 + $0x10] sm:$0xff] }
   0x3   :  { %3364 = vmatprep.subr.mxu0 %v3506_v2  ;;  %3465 = vmatprep.mubr.msk.f32.mxu1 %vm3507_vm0, %v3506_v2  ;;  %v54_v8 = vunpack.c.0.s8 %v53_v5  ;;  %v23_v10 = vld [vmem:[%s4397_s0] sm:$0xff]  ;;  %v100_v14 = vcombine.high %v24_v11, %v24_v11  ;;  %v3579_v17 = vld [vmem:[%s4397_s0 + $0x18] sm:$0xff]  ;;  %v149_v20 = vcombine.high %v25_v16, %v25_v16  ;;  %v677_v27 = vld [vmem:[%s4398_s1 + $0x50] sm:$0xff] }
   0x4   :  { %3365 = vmatpush3.msra.mxu0 %v681_v3  ;;  %v51_v12 = vcombine.high %v23_v10, %v23_v10  ;;  %v3153_v15 = vadd.f32 %v24_v11, %v23_v10  ;;  %v3584_v18 = vld [vmem:[%s4397_s0 + $0x20] sm:$0xff]  ;;  %v678_v19 = vld [vmem:[%s4398_s1 + $0x58] sm:$0xff]  ;;  %v198_v21 = vcombine.high %v3579_v17, %v3579_v17  ;;  %v676_v36 = vld [vmem:[%s4398_s1 + $0x48] sm:$0xff] }
   0x5   :  { %3366 = vmatprep.subr.mxu0 %v3506_v2  ;;  %v3571_v13 = vsub.s32 %v54_v8, %v56_v6  ;;  %v247_v22 = vcombine.high %v3584_v18, %v3584_v18  ;;  %v675_v45 = vld [vmem:[%s4398_s1 + $0x40] sm:$0xff]  ;;  %v674_v54 = vld [vmem:[%s4398_s1 + $0x38] sm:$0xff] }
   0x6   :  { %3367 = vmatpush3.msra.mxu0 %v680_v7  ;;  %v3604_v30 = vadd.f32 %v3153_v15, %v25_v16 }
   0x7   :  { %3368 = vmatprep.subr.mxu0 %v3506_v2  ;;  %v58_v23 = vrot.slane %v23_v10, %v3571_v13  ;;  %v65_v24 = vrot.slane %v51_v12, %v3571_v13  ;;  %v107_v25 = vrot.slane %v24_v11, %v3571_v13  ;;  %v114_v26 = vrot.slane %v100_v14, %v3571_v13 }
   0x8   :  { %3369 = vmatpush3.msra.mxu0 %v679_v9  ;;  %v156_v28 = vrot.slane %v25_v16, %v3571_v13  ;;  %v163_v29 = vrot.slane %v149_v20, %v3571_v13  ;;  %v3608_v31 = vrot.slane %v3579_v17, %v3571_v13 }
   0x9   :  { %3370 = vmatprep.subr.mxu0 %v3506_v2  ;;  %v66_v32 = vcombine.high %v58_v23, %v58_v23  ;;  %v67_v33 = vcombine.high %v65_v24, %v65_v24  ;;  %v74_v34 = vrot.slane %v58_v23, %v3571_v13  ;;  %v81_v35 = vrot.slane %v65_v24, %v3571_v13 }
   0xa   :  { %3371 = vmatpush3.msra.mxu0 %v678_v19  ;;  %v115_v37 = vcombine.high %v107_v25, %v107_v25  ;;  %v116_v38 = vcombine.high %v114_v26, %v114_v26  ;;  %v123_v39 = vrot.slane %v107_v25, %v3571_v13  ;;  %v130_v40 = vrot.slane %v114_v26, %v3571_v13 }
   0xb   :  { %3372 = vmatprep.subr.mxu0 %v3506_v2  ;;  %v88_v41 = vrot.slane %v66_v32, %v3571_v13  ;;  %v95_v42 = vrot.slane %v67_v33, %v3571_v13  ;;  %v164_v43 = vcombine.high %v156_v28, %v156_v28  ;;  %v165_v44 = vcombine.high %v163_v29, %v163_v29 }
   0xc   :  { %3373 = vmatpush3.msra.mxu0 %v677_v27  ;;  %v137_v46 = vrot.slane %v115_v37, %v3571_v13  ;;  %v144_v47 = vrot.slane %v116_v38, %v3571_v13  ;;  %v172_v48 = vrot.slane %v156_v28, %v3571_v13  ;;  %v179_v49 = vrot.slane %v163_v29, %v3571_v13 }
   0xd   :  { %3374 = vmatprep.subr.mxu0 %v3506_v2  ;;  %v683_v50 = vcombine.low %v74_v34, %v88_v41  ;;  %v3302_v51 = vcombine.high %v74_v34, %v88_v41  ;;  %v685_v52 = vcombine.low %v81_v35, %v95_v42  ;;  %v3303_v53 = vcombine.high %v81_v35, %v95_v42 }
   0xe   :  { %3375 = vmatpush3.msra.mxu0 %v676_v36  ;;  %v732_v55 = vcombine.low %v123_v39, %v137_v46  ;;  %v3304_v56 = vcombine.high %v123_v39, %v137_v46  ;;  %v734_v57 = vcombine.low %v130_v40, %v144_v47  ;;  %v3305_v58 = vcombine.high %v130_v40, %v144_v47 }
   0xf   :  { %3376 = vmatprep.subr.mxu0 %v3506_v2 }
  0x10   :  { %12 = vsyncpa [#allocation3], 0  ;;  %3377 = vmatpush3.msra.mxu0 %v675_v45  ;;  %v693_v59 = vrot.slane %v683_v50, %v3571_v13  ;;  %v700_v60 = vrot.slane %v3302_v51, %v3571_v13  ;;  %v707_v61 = vrot.slane %v685_v52, %v3571_v13  ;;  %v714_v62 = vrot.slane %v3303_v53, %v3571_v13  ;;  %v673_v63 = vld [vmem:[%s4398_s1 + $0x30] sm:$0xff]  ;;  %v672_v9 = vld [vmem:[%s4398_s1 + $0x28] sm:$0xff]  ;;  %s3509_s12 = smov [#allocation2]  }
  0x11   :  { %3378 = vmatprep.subr.mxu0 %v3506_v2  ;;  %v742_v0 = vrot.slane %v732_v55, %v3571_v13  ;;  %v749_v1 = vrot.slane %v3304_v56, %v3571_v13  ;;  %v756_v3 = vrot.slane %v734_v57, %v3571_v13  ;;  %v763_v4 = vrot.slane %v3305_v58, %v3571_v13  ;;  %v671_v23 = vld [vmem:[%s4398_s1 + $0x20] sm:$0xff]  ;;  %v3679_v33 = vld [vmem:[%s4397_s0 + $0x28] sm:$0xff]  ;;  %v670_v34 = vld [vmem:[%s4398_s1 + $0x18] sm:$0xff]  ;;  %s3292_s13 = sshll.u32 %s3509_s12, 4  ;;  %s3293_s13 = int_to_ptr.vmem [resolvable:$true] %s3292_s13 }
  0x12   :  { %3379 = vmatpush3.msra.mxu0 %v674_v54  ;;  %v715_v5 = vcombine.low %v693_v59, %v700_v60  ;;  %v716_v6 = vcombine.low %v707_v61, %v714_v62  ;;  %v186_v7 = vrot.slane %v164_v43, %v3571_v13  ;;  %v193_v8 = vrot.slane %v165_v44, %v3571_v13  ;;  %v669_v43 = vld [vmem:[%s4398_s1 + $0x10] sm:$0xff]  ;;  %v668_v51 = vld [vmem:[%s4398_s1 + $0x8] sm:$0xff]  ;;  %v667_v60 = vld [vmem:[%s4398_s1] sm:$0xff]  ;;  %p3489_p1 = scmp.lt.s32.totalorder %s3293_s13, %s3293_s13 }
  0x13   :  { %3380 = vmatprep.subr.mxu0 %v3506_v2  ;;  %v764_v10 = vcombine.low %v742_v0, %v749_v1  ;;  %v765_v11 = vcombine.low %v756_v3, %v763_v4  ;;  %v212_v12 = vrot.slane %v198_v21, %v3571_v13  ;;  %v213_v14 = vcombine.high %v3608_v31, %v3608_v31  ;;  %v3723_v59 = vld [vmem:[%s4397_s0 + $0x30] sm:$0x1] }
  0x14   :  { %3381 = vmatpush3.msra.mxu0 %v673_v63  ;;  %v3657_v15 = vrot.slane %v715_v5, %v3571_v13  ;;  %v3660_v16 = vrot.slane %v716_v6, %v3571_v13  ;;  %v781_v19 = vcombine.low %v172_v48, %v186_v7  ;;  %v3306_v20 = vcombine.high %v172_v48, %v186_v7 }
  0x15   :  { %3382 = vmatprep.subr.mxu0 %v3506_v2  ;;  %v3667_v21 = vrot.slane %v764_v10, %v3571_v13  ;;  %v3670_v24 = vrot.slane %v765_v11, %v3571_v13  ;;  %v783_v25 = vcombine.low %v179_v49, %v193_v8  ;;  %v3307_v26 = vcombine.high %v179_v49, %v193_v8 }
  0x16   :  { %3383 = vmatpush3.msra.mxu0 %v672_v9  ;;  %v731_v27 = vcombine.low %v3657_v15, %v3660_v16  ;;  %v791_v28 = vrot.slane %v781_v19, %v3571_v13  ;;  %v798_v29 = vrot.slane %v3306_v20, %v3571_v13  ;;  %v214_v32 = vcombine.high %v212_v12, %v212_v12  ;;  %v3198_v15 = vld [vmem:[%s4400_s3 + $0x78] sm:$0xff] }
  0x17   :  { %3384 = vmatprep.subr.mxu0 %v3506_v2  ;;  %v780_v35 = vcombine.low %v3667_v21, %v3670_v24  ;;  %v805_v36 = vrot.slane %v783_v25, %v3571_v13  ;;  %v812_v37 = vrot.slane %v3307_v26, %v3571_v13  ;;  %v221_v38 = vrot.slane %v3608_v31, %v3571_v13  ;;  %v3755_v25 = vld [vmem:[%s4397_s0 + $0x38] sm:$0xff] }
  0x18   :  { %3385 = vmatpush3.msra.mxu0 %v671_v23  ;;  %v813_v39 = vcombine.low %v791_v28, %v798_v29  ;;  %v228_v40 = vrot.slane %v212_v12, %v3571_v13  ;;  %v235_v41 = vrot.slane %v213_v14, %v3571_v13  ;;  %v242_v42 = vrot.slane %v214_v32, %v3571_v13 }
  0x19   :  { %3386 = vmatprep.subr.mxu0 %v3506_v2  ;;  %v814_v44 = vcombine.low %v805_v36, %v812_v37  ;;  %v254_v45 = vrot.slane %v3584_v18, %v3571_v13  ;;  %v261_v31 = vrot.slane %v247_v22, %v3571_v13  ;;  %v296_v46 = vcombine.high %v3679_v33, %v3679_v33 }
  0x1a   :  { %3387 = vmatpush3.msra.mxu0 %v670_v34  ;;  %v3707_v47 = vrot.slane %v813_v39, %v3571_v13  ;;  %v830_v48 = vcombine.low %v221_v38, %v235_v41  ;;  %v3308_v49 = vcombine.high %v221_v38, %v235_v41  ;;  %v832_v50 = vcombine.low %v228_v40, %v242_v42 }
  0x1b   :  { %3388 = vmatprep.subr.mxu0 %v3506_v2  ;;  %v3714_v52 = vrot.slane %v814_v44, %v3571_v13  ;;  %v3309_v22 = vcombine.high %v228_v40, %v242_v42  ;;  %v262_v53 = vcombine.high %v254_v45, %v254_v45  ;;  %v263_v54 = vcombine.high %v261_v31, %v261_v31  ;;  %v3197_v42 = vld [vmem:[%s4400_s3 + $0x70] sm:$0xff] }
  0x1c   :  { %3389 = vmatpush3.msra.mxu0 %v669_v43  ;;  %v840_v55 = vrot.slane %v830_v48, %v3571_v13  ;;  %v847_v56 = vrot.slane %v3308_v49, %v3571_v13  ;;  %v854_v57 = vrot.slane %v832_v50, %v3571_v13  ;;  %v270_v58 = vrot.slane %v254_v45, %v3571_v13 }
  0x1d   :  { %3390 = vmatprep.subr.mxu0 %v3506_v2  ;;  %v829_v61 = vcombine.low %v3707_v47, %v3714_v52  ;;  %v861_v62 = vrot.slane %v3309_v22, %v3571_v13  ;;  %v277_v63 = vrot.slane %v261_v31, %v3571_v13  ;;  %v284_v0 = vrot.slane %v262_v53, %v3571_v13  ;;  %v31_v22 = vld [vmem:[%s4397_s0 + $0x40] sm:$0xff] }
  0x1e   :  { %3391 = vmatpush3.msra.mxu0 %v668_v51  ;;  %v862_v1 = vcombine.low %v840_v55, %v847_v56  ;;  %v291_v3 = vrot.slane %v263_v54, %v3571_v13  ;;  %v303_v4 = vrot.slane %v3679_v33, %v3571_v13  ;;  %v310_v5 = vrot.slane %v296_v46, %v3571_v13 }
  0x1f   :  { %3392 = vmatprep.subr.mxu0 %v3506_v2  ;;  %v863_v6 = vcombine.low %v854_v57, %v861_v62  ;;  %v879_v7 = vcombine.low %v270_v58, %v284_v0  ;;  %v3310_v8 = vcombine.high %v270_v58, %v284_v0  ;;  %v351_v9 = vrot.slane %v3723_v59, %v3571_v13  ;;  %v3196_v57 = vld [vmem:[%s4400_s3 + $0x68] sm:$0xff] }
  0x20   :  { %3393 = vmatpush3.msra.mxu0 %v667_v60  ;;  %v3742_v10 = vrot.slane %v862_v1, %v3571_v13  ;;  %v881_v11 = vcombine.low %v277_v63, %v291_v3  ;;  %v3311_v12 = vcombine.high %v277_v63, %v291_v3  ;;  %v311_v14 = vcombine.high %v303_v4, %v303_v4 }
  0x21   :  { %3395 = vmatmul.mubr.f32.vlgmr.msra.gmra.mxu0 %v731_v27  ;;  %v3748_v16 = vrot.slane %v863_v6, %v3571_v13  ;;  %v889_v19 = vrot.slane %v879_v7, %v3571_v13  ;;  %v896_v20 = vrot.slane %v3310_v8, %v3571_v13  ;;  %v312_v23 = vcombine.high %v310_v5, %v310_v5 }
  0x22   :  { %3397 = vmatprep.mubr.msk.f32.mxu0 %vm3507_vm0, %v3506_v2  ;;  %v903_v26 = vrot.slane %v881_v11, %v3571_v13  ;;  %v910_v27 = vrot.slane %v3311_v12, %v3571_v13  ;;  %v319_v28 = vrot.slane %v303_v4, %v3571_v13  ;;  %v326_v29 = vrot.slane %v310_v5, %v3571_v13 }
  0x23   :  { %v878_v32 = vcombine.low %v3742_v10, %v3748_v16  ;;  %v911_v34 = vcombine.low %v889_v19, %v896_v20  ;;  %v333_v36 = vrot.slane %v311_v14, %v3571_v13  ;;  %v340_v37 = vrot.slane %v312_v23, %v3571_v13  ;;  %3434 = vmatpush3.msra.mxu1 %v3198_v15  ;;  %v3195_v10 = vld [vmem:[%s4400_s3 + $0x60] sm:$0xff]  ;;  %v32_v16 = vld [vmem:[%s4397_s0 + $0x48] sm:$0xff] }
  0x24   :  { %v912_v38 = vcombine.low %v903_v26, %v910_v27  ;;  %v358_v39 = vrot.slane %v351_v9, %v3571_v13  ;;  %v359_v40 = vcombine.high %v3755_v25, %v3755_v25  ;;  %v366_v41 = vrot.slane %v3755_v25, %v3571_v13  ;;  %3435 = vmatprep.subr.mxu1 %v3506_v2 }
  0x25   :  { %3398 = vmatmul.mubr.f32.gmra.mxu0 %v780_v35  ;;  %v3780_v43 = vrot.slane %v911_v34, %v3571_v13  ;;  %v928_v44 = vcombine.low %v319_v28, %v333_v36  ;;  %v3312_v45 = vcombine.high %v319_v28, %v333_v36  ;;  %v930_v31 = vcombine.low %v326_v29, %v340_v37 }
  0x26   :  { %3400 = vmatprep.mubr.msk.f32.mxu0 %vm3507_vm0, %v3506_v2  ;;  %v926_v46 = vrot.slane %v912_v38, %v3571_v13  ;;  %v3313_v48 = vcombine.high %v326_v29, %v340_v37  ;;  %v373_v49 = vrot.slane %v359_v40, %v3571_v13  ;;  %v374_v50 = vcombine.high %v366_v41, %v366_v41  ;;  %v3194_v38 = vld [vmem:[%s4400_s3 + $0x58] sm:$0xff] }
  0x27   :  { %v938_v51 = vrot.slane %v928_v44, %v3571_v13  ;;  %v945_v21 = vrot.slane %v3312_v45, %v3571_v13  ;;  %v952_v24 = vrot.slane %v930_v31, %v3571_v13  ;;  %v382_v35 = vrot.slane %v366_v41, %v3571_v13  ;;  %3436 = vmatpush3.msra.mxu1 %v3197_v42 }
  0x28   :  { %v927_v53 = vcombine.low %v3780_v43, %v926_v46  ;;  %v959_v54 = vrot.slane %v3313_v48, %v3571_v13  ;;  %v375_v55 = vcombine.high %v373_v49, %v373_v49  ;;  %v389_v56 = vrot.slane %v373_v49, %v3571_v13  ;;  %3437 = vmatprep.subr.mxu1 %v3506_v2 }
  0x29   :  { %3401 = vmatmul.mubr.f32.gmra.mxu0 %v829_v61  ;;  %v960_v58 = vcombine.low %v938_v51, %v945_v21  ;;  %v396_v60 = vrot.slane %v374_v50, %v3571_v13  ;;  %v404_v62 = vcombine.high %v382_v35, %v382_v35  ;;  %v977_v63 = vcombine.low %v358_v39, %v382_v35 }
  0x2a   :  { %3403 = vmatprep.mubr.msk.f32.mxu0 %vm3507_vm0, %v3506_v2  ;;  %v961_v0 = vcombine.low %v952_v24, %v959_v54  ;;  %v403_v1 = vrot.slane %v375_v55, %v3571_v13  ;;  %v405_v3 = vcombine.high %v389_v56, %v389_v56  ;;  %v408_v4 = vcombine.high %v31_v22, %v31_v22 }
  0x2b   :  { %v968_v5 = vrot.slane %v960_v58, %v3571_v13  ;;  %v406_v6 = vcombine.high %v396_v60, %v396_v60  ;;  %v978_v7 = vcombine.low %v396_v60, %v404_v62  ;;  %v987_v47 = vrot.slane %v977_v63, %v3571_v13  ;;  %3438 = vmatpush3.msra.mxu1 %v3196_v57  ;;  %v3855_v63 = vld [vmem:[%s4397_s0 + $0x50] sm:$0xff] }
  0x2c   :  { %v975_v52 = vrot.slane %v961_v0, %v3571_v13  ;;  %v980_v61 = vcombine.low %v403_v1, %v405_v3  ;;  %v407_v8 = vcombine.high %v403_v1, %v403_v1  ;;  %v415_v9 = vrot.slane %v31_v22, %v3571_v13  ;;  %3439 = vmatprep.subr.mxu1 %v3506_v2 }
  0x2d   :  { %3404 = vmatmul.mubr.f32.gmra.mxu0 %v878_v32  ;;  %v979_v11 = vcombine.low %v406_v6, %v389_v56  ;;  %v994_v12 = vrot.slane %v978_v7, %v3571_v13  ;;  %v422_v14 = vrot.slane %v408_v4, %v3571_v13  ;;  %v3167_v15 = vadd.f32 %v31_v22, %v3755_v25  ;;  %v3193_v22 = vld [vmem:[%s4400_s3 + $0x50] sm:$0xff] }
  0x2e   :  { %3406 = vmatprep.mubr.msk.f32.mxu0 %vm3507_vm0, %v3506_v2  ;;  %v976_v19 = vcombine.low %v968_v5, %v975_v52  ;;  %v1008_v20 = vrot.slane %v980_v61, %v3571_v13  ;;  %v423_v23 = vcombine.high %v415_v9, %v415_v9  ;;  %v431_v26 = vrot.slane %v415_v9, %v3571_v13  ;;  %v3864_v52 = vld [vmem:[%s4397_s0 + $0x58] sm:$0xff]  ;;  %v3192_v61 = vld [vmem:[%s4400_s3 + $0x48] sm:$0xff] }
  0x2f   :  { %v1001_v27 = vrot.slane %v979_v11, %v3571_v13  ;;  %v1009_v28 = vcombine.low %v987_v47, %v994_v12  ;;  %v424_v29 = vcombine.high %v422_v14, %v422_v14  ;;  %v438_v32 = vrot.slane %v422_v14, %v3571_v13  ;;  %3440 = vmatpush3.msra.mxu1 %v3195_v10 }
  0x30   :  { %v445_v25 = vrot.slane %v423_v23, %v3571_v13  ;;  %v453_v34 = vcombine.high %v431_v26, %v431_v26  ;;  %v1026_v36 = vcombine.low %v407_v8, %v431_v26  ;;  %v457_v37 = vcombine.high %v32_v16, %v32_v16  ;;  %3441 = vmatprep.subr.mxu1 %v3506_v2 }
  0x31   :  { %3407 = vmatmul.mubr.f32.gmra.mxu0 %v927_v53  ;;  %v1010_v39 = vcombine.low %v1001_v27, %v1008_v20  ;;  %v1017_v40 = vrot.slane %v1009_v28, %v3571_v13  ;;  %v452_v41 = vrot.slane %v424_v29, %v3571_v13  ;;  %v454_v42 = vcombine.high %v438_v32, %v438_v32 }
  0x32   :  { %3409 = vmatprep.mubr.msk.f32.mxu0 %vm3507_vm0, %v3506_v2  ;;  %v455_v43 = vcombine.high %v445_v25, %v445_v25  ;;  %v1027_v44 = vcombine.low %v445_v25, %v453_v34  ;;  %v1036_v45 = vrot.slane %v1026_v36, %v3571_v13  ;;  %v464_v31 = vrot.slane %v32_v16, %v3571_v13 }
  0x33   :  { %v1024_v46 = vrot.slane %v1010_v39, %v3571_v13  ;;  %v1029_v48 = vcombine.low %v452_v41, %v454_v42  ;;  %v456_v49 = vcombine.high %v452_v41, %v452_v41  ;;  %v471_v50 = vrot.slane %v457_v37, %v3571_v13  ;;  %3442 = vmatpush3.msra.mxu1 %v3194_v38 }
  0x34   :  { %v1028_v51 = vcombine.low %v455_v43, %v438_v32  ;;  %v1043_v21 = vrot.slane %v1027_v44, %v3571_v13  ;;  %v472_v24 = vcombine.high %v464_v31, %v464_v31  ;;  %v480_v35 = vrot.slane %v464_v31, %v3571_v13  ;;  %3443 = vmatprep.subr.mxu1 %v3506_v2  ;;  %v3190_v43 = vld [vmem:[%s4400_s3 + $0x38] sm:$0xff] }
  0x35   :  { %3410 = vmatmul.mubr.f32.gmra.mxu0 %v976_v19  ;;  %v1025_v53 = vcombine.low %v1017_v40, %v1024_v46  ;;  %v1057_v54 = vrot.slane %v1029_v48, %v3571_v13  ;;  %v473_v55 = vcombine.high %v471_v50, %v471_v50  ;;  %v487_v56 = vrot.slane %v471_v50, %v3571_v13  ;;  %v3191_v19 = vld [vmem:[%s4400_s3 + $0x40] sm:$0xff] }
  0x36   :  { %3412 = vmatprep.mubr.msk.f32.mxu0 %vm3507_vm0, %v3506_v2  ;;  %v1050_v57 = vrot.slane %v1028_v51, %v3571_v13  ;;  %v1058_v58 = vcombine.low %v1036_v45, %v1043_v21  ;;  %v494_v60 = vrot.slane %v472_v24, %v3571_v13  ;;  %v502_v62 = vcombine.high %v480_v35, %v480_v35  ;;  %v3189_v21 = vld [vmem:[%s4400_s3 + $0x30] sm:$0xff] }
  0x37   :  { %v501_v0 = vrot.slane %v473_v55, %v3571_v13  ;;  %v503_v1 = vcombine.high %v487_v56, %v487_v56  ;;  %v1075_v3 = vcombine.low %v456_v49, %v480_v35  ;;  %v3858_v4 = vadd.f32 %v3167_v15, %v32_v16  ;;  %3444 = vmatpush3.msra.mxu1 %v3193_v22 }
  0x38   :  { %v1059_v5 = vcombine.low %v1050_v57, %v1057_v54  ;;  %v1066_v6 = vrot.slane %v1058_v58, %v3571_v13  ;;  %v504_v7 = vcombine.high %v494_v60, %v494_v60  ;;  %v1076_v47 = vcombine.low %v494_v60, %v502_v62  ;;  %3445 = vmatprep.subr.mxu1 %v3506_v2  ;;  %v3913_v58 = vld [vmem:[%s4397_s0 + $0x60] sm:$0xff] }
  0x39   :  { %3413 = vmatmul.mubr.f32.gmra.mxu0 %v1025_v53  ;;  %v1078_v8 = vcombine.low %v501_v0, %v503_v1  ;;  %v1085_v9 = vrot.slane %v1075_v3, %v3571_v13  ;;  %v505_v10 = vcombine.high %v501_v0, %v501_v0  ;;  %v506_v11 = vcombine.high %v3855_v63, %v3855_v63 }
  0x3a   :  { %3415 = vmatprep.mubr.msk.f32.mxu0 %vm3507_vm0, %v3506_v2  ;;  %v1073_v12 = vrot.slane %v1059_v5, %v3571_v13  ;;  %v1077_v14 = vcombine.low %v504_v7, %v487_v56  ;;  %v1092_v15 = vrot.slane %v1076_v47, %v3571_v13  ;;  %v513_v16 = vrot.slane %v3855_v63, %v3571_v13  ;;  %v3188_v47 = vld [vmem:[%s4400_s3 + $0x28] sm:$0xff] }
  0x3b   :  { %v1106_v20 = vrot.slane %v1078_v8, %v3571_v13  ;;  %v520_v23 = vrot.slane %v506_v11, %v3571_v13  ;;  %v555_v26 = vcombine.high %v3864_v52, %v3864_v52  ;;  %v562_v27 = vrot.slane %v3864_v52, %v3571_v13  ;;  %3446 = vmatpush3.msra.mxu1 %v3192_v61  ;;  %v3930_v11 = vld [vmem:[%s4397_s0 + $0x68] sm:$0x1] }
  0x3c   :  { %v1074_v28 = vcombine.low %v1066_v6, %v1073_v12  ;;  %v1099_v29 = vrot.slane %v1077_v14, %v3571_v13  ;;  %v1107_v32 = vcombine.low %v1085_v9, %v1092_v15  ;;  %v521_v25 = vcombine.high %v513_v16, %v513_v16  ;;  %3447 = vmatprep.subr.mxu1 %v3506_v2 }
  0x3d   :  { %v522_v34 = vcombine.high %v520_v23, %v520_v23  ;;  %v529_v36 = vrot.slane %v513_v16, %v3571_v13  ;;  %v536_v37 = vrot.slane %v520_v23, %v3571_v13  ;;  %v569_v38 = vrot.slane %v555_v26, %v3571_v13  ;;  %3448 = vmatpush3.msra.mxu1 %v3191_v19  ;;  %v3187_v19 = vld [vmem:[%s4400_s3 + $0x20] sm:$0xff] }
  0x3e   :  { %3416 = vmatmul.mubr.f32.gmra.mxu0 %v1074_v28  ;;  %v1108_v39 = vcombine.low %v1099_v29, %v1106_v20  ;;  %v1115_v40 = vrot.slane %v1107_v32, %v3571_v13  ;;  %v543_v41 = vrot.slane %v521_v25, %v3571_v13  ;;  %v570_v42 = vcombine.high %v562_v27, %v562_v27 }
  0x3f   :  { %3418 = vmatprep.mubr.msk.f32.mxu0 %vm3507_vm0, %v3506_v2  ;;  %v550_v44 = vrot.slane %v522_v34, %v3571_v13  ;;  %v551_v45 = vcombine.high %v529_v36, %v529_v36  ;;  %v552_v31 = vcombine.high %v536_v37, %v536_v37  ;;  %v1124_v46 = vcombine.low %v505_v10, %v529_v36  ;;  %v3186_v34 = vld [vmem:[%s4400_s3 + $0x18] sm:$0xff] }
  0x40   :  { %v1122_v48 = vrot.slane %v1108_v39, %v3571_v13  ;;  %v553_v49 = vcombine.high %v543_v41, %v543_v41  ;;  %v571_v50 = vcombine.high %v569_v38, %v569_v38  ;;  %v578_v51 = vrot.slane %v562_v27, %v3571_v13  ;;  %3449 = vmatprep.subr.mxu1 %v3506_v2 }
  0x41   :  { %v1125_v24 = vcombine.low %v543_v41, %v551_v45  ;;  %v1127_v35 = vcombine.low %v550_v44, %v552_v31  ;;  %v1134_v22 = vrot.slane %v1124_v46, %v3571_v13  ;;  %v554_v53 = vcombine.high %v550_v44, %v550_v44  ;;  %3450 = vmatpush3.msra.mxu1 %v3190_v43  ;;  %v3185_v44 = vld [vmem:[%s4400_s3 + $0x10] sm:$0xff] }
  0x42   :  { %v1123_v54 = vcombine.low %v1115_v40, %v1122_v48  ;;  %v1126_v55 = vcombine.low %v553_v49, %v536_v37  ;;  %v585_v56 = vrot.slane %v569_v38, %v3571_v13  ;;  %v592_v57 = vrot.slane %v570_v42, %v3571_v13  ;;  %3451 = vmatprep.subr.mxu1 %v3506_v2 }
  0x43   :  { %v1141_v60 = vrot.slane %v1125_v24, %v3571_v13  ;;  %v1155_v62 = vrot.slane %v1127_v35, %v3571_v13  ;;  %v599_v0 = vrot.slane %v571_v50, %v3571_v13  ;;  %v600_v1 = vcombine.high %v578_v51, %v578_v51  ;;  %3452 = vmatpush3.msra.mxu1 %v3189_v21  ;;  %v3184_v21 = vld [vmem:[%s4400_s3 + $0x8] sm:$0xff] }
  0x44   :  { %3419 = vmatmul.mubr.f32.gmra.mxu0 %v1123_v54  ;;  %v1148_v3 = vrot.slane %v1126_v55, %v3571_v13  ;;  %v601_v5 = vcombine.high %v585_v56, %v585_v56  ;;  %v602_v6 = vcombine.high %v592_v57, %v592_v57  ;;  %v1173_v7 = vcombine.low %v554_v53, %v578_v51 }
  0x45   :  { %3421 = vmatprep.mubr.msk.f32.mxu0 %vm3507_vm0, %v3506_v2  ;;  %v1156_v61 = vcombine.low %v1134_v22, %v1141_v60  ;;  %v1174_v8 = vcombine.low %v592_v57, %v600_v1  ;;  %v603_v9 = vcombine.high %v599_v0, %v599_v0  ;;  %v604_v10 = vcombine.high %v3913_v58, %v3913_v58 }
  0x46   :  { %v1157_v12 = vcombine.low %v1148_v3, %v1155_v62  ;;  %v1175_v14 = vcombine.low %v602_v6, %v585_v56  ;;  %v1176_v15 = vcombine.low %v599_v0, %v601_v5  ;;  %v1183_v16 = vrot.slane %v1173_v7, %v3571_v13  ;;  %3453 = vmatprep.subr.mxu1 %v3506_v2  ;;  %v3183_v56 = vld [vmem:[%s4400_s3] sm:$0xff] }
  0x47   :  { %v1164_v20 = vrot.slane %v1156_v61, %v3571_v13  ;;  %v1190_v23 = vrot.slane %v1174_v8, %v3571_v13  ;;  %v611_v26 = vrot.slane %v3913_v58, %v3571_v13  ;;  %v618_v27 = vrot.slane %v604_v10, %v3571_v13  ;;  %3454 = vmatpush3.msra.mxu1 %v3188_v47 }
  0x48   :  { %v1171_v28 = vrot.slane %v1157_v12, %v3571_v13  ;;  %v1197_v29 = vrot.slane %v1175_v14, %v3571_v13  ;;  %v1204_v32 = vrot.slane %v1176_v15, %v3571_v13  ;;  %v659_v25 = vrot.slane %v3930_v11, %v3571_v13  ;;  %3455 = vmatprep.subr.mxu1 %v3506_v2 }
  0x49   :  { %v1205_v36 = vcombine.low %v1183_v16, %v1190_v23  ;;  %v619_v37 = vcombine.high %v611_v26, %v611_v26  ;;  %v620_v38 = vcombine.high %v618_v27, %v618_v27  ;;  %v627_v39 = vrot.slane %v611_v26, %v3571_v13  ;;  %3456 = vmatpush3.msra.mxu1 %v3187_v19 }
  0x4a   :  { %v1172_v40 = vcombine.low %v1164_v20, %v1171_v28  ;;  %v1206_v41 = vcombine.low %v1197_v29, %v1204_v32  ;;  %v634_v42 = vrot.slane %v618_v27, %v3571_v13  ;;  %v666_v43 = vrot.slane %v659_v25, %v3571_v13  ;;  %3457 = vmatprep.subr.mxu1 %v3506_v2 }
  0x4b   :  { %v1213_v45 = vrot.slane %v1205_v36, %v3571_v13  ;;  %v641_v31 = vrot.slane %v619_v37, %v3571_v13  ;;  %v648_v46 = vrot.slane %v620_v38, %v3571_v13  ;;  %v649_v48 = vcombine.high %v627_v39, %v627_v39  ;;  %3458 = vmatpush3.msra.mxu1 %v3186_v34  ;;  %v3314_v34 = vld [vmem:[%s4399_s2] ss:$0 sm:$0xff] }
  0x4c   :  { %3422 = vmatmul.mubr.f32.gmra.mxu0 %v1172_v40  ;;  %v1220_v49 = vrot.slane %v1206_v41, %v3571_v13  ;;  %v650_v50 = vcombine.high %v634_v42, %v634_v42  ;;  %v1222_v51 = vcombine.low %v603_v9, %v627_v39  ;;  %3459 = vmatprep.subr.mxu1 %v3506_v2  ;;  %vm3158_vm1 = vcmask 1040384  }
  0x4d   :  { %3424 = vmatprep.mubr.msk.f32.mxu0 %vm3507_vm0, %v3506_v2  ;;  %v651_v24 = vcombine.high %v641_v31, %v641_v31  ;;  %v1223_v35 = vcombine.low %v641_v31, %v649_v48  ;;  %v652_v22 = vcombine.high %v648_v46, %v648_v46  ;;  %3460 = vmatpush3.msra.mxu1 %v3185_v44  ;;  %v3159_v6 = vsel %vm3158_vm1, %v3723_v59, 0.0 }
  0x4e   :  { %v1221_v53 = vcombine.low %v1213_v45, %v1220_v49  ;;  %v1225_v54 = vcombine.low %v648_v46, %v650_v50  ;;  %v1232_v55 = vrot.slane %v1222_v51, %v3571_v13  ;;  %3461 = vmatprep.subr.mxu1 %v3506_v2  ;;  %v3155_v57 = vadd.f32 %v3604_v30, %v3579_v17 }
  0x4f   :  { %v1224_v60 = vcombine.low %v651_v24, %v634_v42  ;;  %v1239_v62 = vrot.slane %v1223_v35, %v3571_v13  ;;  %3462 = vmatpush3.msra.mxu1 %v3184_v21  ;;  %v3169_v0 = vadd.f32 %v3858_v4, %v3855_v63  ;;  %v1271_v30 = vcombine.low %v652_v22, %v666_v43 }
  0x50   :  { %3425 = vmatmul.mubr.f32.gmra.mxu0 %v1221_v53  ;;  %v1253_v1 = vrot.slane %v1225_v54, %v3571_v13  ;;  %3463 = vmatprep.subr.mxu1 %v3506_v2  ;;  %v3156_v3 = vadd.f32 %v3155_v57, %v3584_v18  ;;  %v3172_v18 = vsel %vm3158_vm1, %v3930_v11, 0.0  ;;  %vm3208_vm2 = vcmask 1041409  }
  0x51   :  { %3427 = vmatprep.mubr.msk.f32.mxu0 %vm3507_vm0, %v3506_v2  ;;  %v1246_v5 = vrot.slane %v1224_v60, %v3571_v13  ;;  %v1254_v17 = vcombine.low %v1232_v55, %v1239_v62  ;;  %3464 = vmatpush3.msra.mxu1 %v3183_v56  ;;  %v3170_v4 = vadd.f32 %v3169_v0, %v3864_v52  ;;  %vm3137_vm3 = vcmask 261120  }
  0x52   :  { %v3157_v63 = vadd.f32 %v3156_v3, %v3679_v33  ;;  %v1278_v10 = vrot.slane %v1271_v30, %v3571_v13  ;;  %v2163_v36 = vrot.slane %v3314_v34, %v3571_v13  ;;  %vm3144_vm4 = vcmask 253952  }
  0x53   :  { %v1255_v7 = vcombine.low %v1246_v5, %v1253_v1  ;;  %v1262_v47 = vrot.slane %v1254_v17, %v3571_v13  ;;  %v3171_v8 = vadd.f32 %v3170_v4, %v3913_v58  ;;  %vm3282_vm5 = vcmask 123904  }
  0x54   :  { %v3160_v61 = vadd.f32 %v3159_v6, %v3157_v63  ;;  %v1285_v52 = vrot.slane %v1278_v10, %v3571_v13  ;;  %v2171_v38 = vcombine.high %v2163_v36, %v2163_v36  ;;  %v4003_v41 = vrot.slane %v2163_v36, %v3571_v13 }
  0x55   :  { %v1269_v9 = vrot.slane %v1255_v7, %v3571_v13  ;;  %v3173_v14 = vadd.f32 %v3172_v18, %v3171_v8 }
  0x56   :  { %v3161_v12 = vrot.slane %v3160_v61, 4  ;;  %v4009_v43 = vrot.slane %v2171_v38, %v3571_v13  ;;  %v4019_v51 = vcombine.high %v4003_v41, %v4003_v41 }
  0x57   :  { %v1270_v59 = vcombine.low %v1262_v47, %v1269_v9  ;;  %v3174_v33 = vrot.slane %v3173_v14, 4 }
  0x58   :  { %v3162_v15 = vadd.f32 %v3161_v12, %v3160_v61  ;;  %v4027_v24 = vcombine.high %v4009_v43, %v4009_v43 }
  0x59   :  { %3428 = vmatmul.mubr.f32.gmra.mxu0 %v1270_v59  ;;  %v3175_v11 = vadd.f32 %v3174_v33, %v3173_v14 }
  0x5a   :  { %3430 = vmatprep.mubr.msk.f32.mxu0 %vm3507_vm0, %v3506_v2  ;;  %v3163_v16 = vrot.slane %v3162_v15, 2  ;;  %v2156_v2 = vcombine.high %v3314_v34, %v3314_v34 }
  0x5b   :  { %v3176_v20 = vrot.slane %v3175_v11, 2 }
  0x5c   :  { %v3164_v19 = vadd.f32 %v3163_v16, %v3162_v15  ;;  %v2170_v37 = vrot.slane %v2156_v2, %v3571_v13 }
  0x5d   :  { %3431 = vmatmul.mubr.f32.gmra.mxu0 %v1285_v52  ;;  %v3177_v23 = vadd.f32 %v3176_v20, %v3175_v11 }
  0x5e   :  { %v3165_v58 = vrot.slane %v3164_v19, 1  ;;  %v2172_v39 = vcombine.high %v2170_v37, %v2170_v37  ;;  %v4006_v42 = vrot.slane %v2170_v37, %v3571_v13 }
  0x5f   :  { %v3178_v27 = vrot.slane %v3177_v23, 1 }
  0x60   :  { %v3166_v26 = vadd.f32 %v3165_v58, %v3164_v19  ;;  %v4013_v31 = vrot.slane %v2172_v39, %v3571_v13  ;;  %v4023_v21 = vcombine.high %v4006_v42, %v4006_v42 }
  0x61   :  { %v3179_v28 = vadd.f32 %v3178_v27, %v3177_v23 }
  0x62   :  { %v3181_v29 = vmul.f32 0.020408163, %v3166_v26  ;;  %v4033_v56 = vcombine.high %v4013_v31, %v4013_v31 }
  0x63   :  { %v3182_v32 = vmul.f32 0.020408163, %v3179_v28 }
  0x65   :  { %v3209_v25 = vsel %vm3208_vm2, %v3182_v32, %v3181_v29 }
  0x66   :  { %3466 = vmatmul.mubr.f32.vlgmr.msra.gmra.mxu1 %v3209_v25 }
  0xe1   :  { %v1365_v40 = vpop.f32.mrf.mxu0 }
  0xe2   :  { %v1442_v44 = vcombine.high %v1365_v40, %v1365_v40  ;;  %v1449_v45 = vrot.slane %v1365_v40, %v3571_v13 }
  0xe3   :  { %v3396_v46 = vpop.f32.mrf.mxu0 }
  0xe4   :  { %v1456_v48 = vrot.slane %v1442_v44, %v3571_v13  ;;  %v1457_v49 = vcombine.high %v1449_v45, %v1449_v45  ;;  %v1465_v50 = vrot.slane %v1449_v45, %v3571_v13 }
  0xe5   :  { %v1370_v35 = vpop.f32.mrf.mxu0 }
  0xe6   :  { %v1458_v22 = vcombine.high %v1456_v48, %v1456_v48  ;;  %v1472_v53 = vrot.slane %v1456_v48, %v3571_v13  ;;  %v1479_v54 = vrot.slane %v1457_v49, %v3571_v13  ;;  %v1487_v55 = vcombine.high %v1465_v50, %v1465_v50 }
  0xe7   :  { %v2213_v57 = vadd.f32 %v4003_v41, %v1465_v50  ;;  %v1491_v60 = vcombine.high %v1370_v35, %v1370_v35  ;;  %v1498_v62 = vrot.slane %v1370_v35, %v3571_v13  ;;  %v3399_v0 = vpop.f32.mrf.mxu0 }
  0xe8   :  { %v1486_v1 = vrot.slane %v1458_v22, %v3571_v13  ;;  %v1488_v3 = vcombine.high %v1472_v53, %v1472_v53  ;;  %v1489_v5 = vcombine.high %v1479_v54, %v1479_v54  ;;  %v2214_v17 = vadd.f32 %v4009_v43, %v1479_v54 }
  0xe9   :  { %v2215_v30 = vadd.f32 %v4019_v51, %v1487_v55  ;;  %v2217_v6 = vadd.f32 %v4006_v42, %v1472_v53  ;;  %v2311_v63 = vmax.f32 %v2213_v57, 0.0  ;;  %v1505_v4 = vrot.slane %v1491_v60, %v3571_v13  ;;  %v4042_v7 = vpop.f32.mrf.mxu0 }
  0xea   :  { %v1490_v47 = vcombine.high %v1486_v1, %v1486_v1  ;;  %v2216_v18 = vadd.f32 %v4027_v24, %v1489_v5  ;;  %v2218_v61 = vadd.f32 %v4013_v31, %v1486_v1  ;;  %v2219_v8 = vadd.f32 %v4023_v21, %v1488_v3 }
  0xeb   :  { %v2312_v9 = vmax.f32 %v2214_v17, 0.0  ;;  %v2313_v10 = vmax.f32 %v2215_v30, 0.0  ;;  %v2315_v12 = vmax.f32 %v2217_v6, 0.0  ;;  %v1506_v14 = vcombine.high %v1498_v62, %v1498_v62  ;;  %v3402_v59 = vpop.f32.mrf.mxu0 }
  0xec   :  { %v2220_v15 = vadd.f32 %v4033_v56, %v1490_v47  ;;  %v2314_v33 = vmax.f32 %v2216_v18, 0.0  ;;  %v2316_v52 = vmax.f32 %v2218_v61, 0.0  ;;  %v2317_v16 = vmax.f32 %v2219_v8, 0.0 }
  0xed   :  { %v2507_v11 = vcombine.low %v2311_v63, %v2312_v9  ;;  %v1507_v19 = vcombine.high %v1505_v4, %v1505_v4  ;;  %v1514_v20 = vrot.slane %v1498_v62, %v3571_v13  ;;  %v1521_v58 = vrot.slane %v1505_v4, %v3571_v13  ;;  %v4050_v23 = vpop.f32.mrf.mxu0 }
  0xee   :  { %v2318_v26 = vmax.f32 %v2220_v15, 0.0  ;;  %v2508_v27 = vcombine.low %v2313_v10, %v2314_v33  ;;  %v2509_v28 = vcombine.low %v2315_v12, %v2316_v52  ;;  %v1528_v29 = vrot.slane %v1506_v14, %v3571_v13 }
  0xef   :  { %v2517_v32 = vrot.slane %v2507_v11, %v3571_v13  ;;  %v1535_v25 = vrot.slane %v1507_v19, %v3571_v13  ;;  %v1536_v34 = vcombine.high %v1514_v20, %v1514_v20  ;;  %v1537_v2 = vcombine.high %v1521_v58, %v1521_v58  ;;  %v3405_v36 = vpop.f32.mrf.mxu0 }
  0xf0   :  { %v2510_v37 = vcombine.low %v2317_v16, %v2318_v26  ;;  %v2524_v38 = vrot.slane %v2508_v27, %v3571_v13  ;;  %v2531_v39 = vrot.slane %v2509_v28, %v3571_v13  ;;  %v1538_v40 = vcombine.high %v1528_v29, %v1528_v29 }
  0xf1   :  { %v1539_v44 = vcombine.high %v1535_v25, %v1535_v25  ;;  %v2221_v45 = vadd.f32 %v4003_v41, %v1514_v20  ;;  %v2222_v46 = vadd.f32 %v4009_v43, %v1528_v29  ;;  %v2223_v48 = vadd.f32 %v4019_v51, %v1536_v34  ;;  %v4060_v49 = vpop.f32.mrf.mxu0 }
  0xf2   :  { %v2538_v50 = vrot.slane %v2510_v37, %v3571_v13  ;;  %v2539_v35 = vcombine.low %v2517_v32, %v2524_v38  ;;  %v2224_v22 = vadd.f32 %v4027_v24, %v1538_v40  ;;  %v2225_v53 = vadd.f32 %v4006_v42, %v1521_v58 }
  0xf3   :  { %v2226_v54 = vadd.f32 %v4013_v31, %v1535_v25  ;;  %v2227_v55 = vadd.f32 %v4023_v21, %v1537_v2  ;;  %v2228_v57 = vadd.f32 %v4033_v56, %v1539_v44  ;;  %v2319_v60 = vmax.f32 %v2221_v45, 0.0  ;;  %v3408_v62 = vpop.f32.mrf.mxu0 }
  0xf4   :  { %v2540_v0 = vcombine.low %v2531_v39, %v2538_v50  ;;  %v2547_v1 = vrot.slane %v2539_v35, %v3571_v13  ;;  %v2320_v3 = vmax.f32 %v2222_v46, 0.0  ;;  %v2321_v5 = vmax.f32 %v2223_v48, 0.0 }
  0xf5   :  { %v2322_v17 = vmax.f32 %v2224_v22, 0.0  ;;  %v2323_v30 = vmax.f32 %v2225_v53, 0.0  ;;  %v2324_v6 = vmax.f32 %v2226_v54, 0.0  ;;  %v2325_v63 = vmax.f32 %v2227_v55, 0.0  ;;  %v4069_v4 = vpop.f32.mrf.mxu0 }
  0xf6   :  { %v2554_v47 = vrot.slane %v2540_v0, %v3571_v13  ;;  %v2326_v18 = vmax.f32 %v2228_v57, 0.0  ;;  %v2556_v61 = vcombine.low %v2319_v60, %v2320_v3  ;;  %v1540_v8 = vcombine.high %v4042_v7, %v4042_v7 }
  0xf7   :  { %v2557_v9 = vcombine.low %v2321_v5, %v2322_v17  ;;  %v2558_v10 = vcombine.low %v2323_v30, %v2324_v6  ;;  %v1547_v12 = vrot.slane %v4042_v7, %v3571_v13  ;;  %v1589_v14 = vcombine.high %v4050_v23, %v4050_v23  ;;  %v3411_v59 = vpop.f32.mrf.mxu0 }
  0xf8   :  { %v2555_v15 = vcombine.low %v2547_v1, %v2554_v47  ;;  %v2559_v33 = vcombine.low %v2325_v63, %v2326_v18  ;;  %v2566_v52 = vrot.slane %v2556_v61, %v3571_v13  ;;  %v1554_v16 = vrot.slane %v1540_v8, %v3571_v13 }
  0xf9   :  { %v2573_v11 = vrot.slane %v2557_v9, %v3571_v13  ;;  %v2580_v19 = vrot.slane %v2558_v10, %v3571_v13  ;;  %v1555_v20 = vcombine.high %v1547_v12, %v1547_v12  ;;  %v1563_v58 = vrot.slane %v1547_v12, %v3571_v13  ;;  %v4083_v26 = vpop.f32.mrf.mxu0 }
  0xfa   :  { %3138 = vst.msk [vmem:[%s4402_s5] sm:$0xff] %vm3137_vm3, %v2555_v15  ;;  %v2587_v7 = vrot.slane %v2559_v33, %v3571_v13  ;;  %v1556_v27 = vcombine.high %v1554_v16, %v1554_v16  ;;  %v1570_v28 = vrot.slane %v1554_v16, %v3571_v13  ;;  %v1596_v29 = vrot.slane %v4050_v23, %v3571_v13 }
  0xfb   :  { %v2588_v32 = vcombine.low %v2566_v52, %v2573_v11  ;;  %v1577_v25 = vrot.slane %v1555_v20, %v3571_v13  ;;  %v1585_v34 = vcombine.high %v1563_v58, %v1563_v58  ;;  %v2229_v2 = vadd.f32 %v4003_v41, %v1563_v58  ;;  %v3414_v36 = vpop.f32.mrf.mxu0 }
  0xfc   :  { %v2589_v37 = vcombine.low %v2580_v19, %v2587_v7  ;;  %v1584_v38 = vrot.slane %v1556_v27, %v3571_v13  ;;  %v1586_v39 = vcombine.high %v1570_v28, %v1570_v28  ;;  %v2233_v40 = vadd.f32 %v4006_v42, %v1570_v28 }
  0xfd   :  { %v2596_v44 = vrot.slane %v2588_v32, %v3571_v13  ;;  %v1587_v45 = vcombine.high %v1577_v25, %v1577_v25  ;;  %v2230_v46 = vadd.f32 %v4009_v43, %v1577_v25  ;;  %v2231_v23 = vadd.f32 %v4019_v51, %v1585_v34 }
  0xfe   :  { %v2603_v48 = vrot.slane %v2589_v37, %v3571_v13  ;;  %v1588_v50 = vcombine.high %v1584_v38, %v1584_v38  ;;  %v2234_v35 = vadd.f32 %v4013_v31, %v1584_v38  ;;  %v2235_v22 = vadd.f32 %v4023_v21, %v1586_v39  ;;  %v4103_v53 = vpop.f32.mrf.mxu0 }
  0xff   :  { %v2232_v54 = vadd.f32 %v4027_v24, %v1587_v45  ;;  %v2327_v55 = vmax.f32 %v2229_v2, 0.0  ;;  %v2328_v57 = vmax.f32 %v2230_v46, 0.0  ;;  %v2329_v60 = vmax.f32 %v2231_v23, 0.0 }
 0x100   :  { %v2604_v62 = vcombine.low %v2596_v44, %v2603_v48  ;;  %v2236_v0 = vadd.f32 %v4033_v56, %v1588_v50  ;;  %v2331_v1 = vmax.f32 %v2233_v40, 0.0  ;;  %v2332_v3 = vmax.f32 %v2234_v35, 0.0  ;;  %v3417_v5 = vpop.f32.mrf.mxu0 }
 0x101   :  { %v2330_v17 = vmax.f32 %v2232_v54, 0.0  ;;  %v2333_v30 = vmax.f32 %v2235_v22, 0.0  ;;  %v2605_v6 = vcombine.low %v2327_v55, %v2328_v57  ;;  %v1603_v63 = vrot.slane %v1589_v14, %v3571_v13 }
 0x102   :  { %3139 = vst.msk [vmem:[%s4402_s5 + $0x8] sm:$0xff] %vm3137_vm3, %v2604_v62  ;;  %v2334_v47 = vmax.f32 %v2236_v0, 0.0  ;;  %v2607_v18 = vcombine.low %v2331_v1, %v2332_v3  ;;  %v1604_v61 = vcombine.high %v1596_v29, %v1596_v29  ;;  %v1612_v8 = vrot.slane %v1596_v29, %v3571_v13 }
 0x103   :  { %v2606_v9 = vcombine.low %v2329_v60, %v2330_v17  ;;  %v2615_v10 = vrot.slane %v2605_v6, %v3571_v13  ;;  %v1605_v12 = vcombine.high %v1603_v63, %v1603_v63  ;;  %v1619_v59 = vrot.slane %v1603_v63, %v3571_v13 }
 0x104   :  { %v2608_v15 = vcombine.low %v2333_v30, %v2334_v47  ;;  %v2629_v33 = vrot.slane %v2607_v18, %v3571_v13  ;;  %v1626_v14 = vrot.slane %v1604_v61, %v3571_v13  ;;  %v1634_v52 = vcombine.high %v1612_v8, %v1612_v8  ;;  %v4117_v16 = vpop.f32.mrf.mxu0 }
 0x105   :  { %v2622_v11 = vrot.slane %v2606_v9, %v3571_v13  ;;  %v1633_v19 = vrot.slane %v1605_v12, %v3571_v13  ;;  %v1635_v20 = vcombine.high %v1619_v59, %v1619_v59  ;;  %v2237_v58 = vadd.f32 %v4003_v41, %v1612_v8 }
 0x106   :  { %v2636_v7 = vrot.slane %v2608_v15, %v3571_v13  ;;  %v1636_v27 = vcombine.high %v1626_v14, %v1626_v14  ;;  %v2238_v28 = vadd.f32 %v4009_v43, %v1626_v14  ;;  %v2239_v29 = vadd.f32 %v4019_v51, %v1634_v52  ;;  %v3420_v32 = vpop.f32.mrf.mxu0 }
 0x107   :  { %v2637_v25 = vcombine.low %v2615_v10, %v2622_v11  ;;  %v1637_v34 = vcombine.high %v1633_v19, %v1633_v19  ;;  %v2241_v2 = vadd.f32 %v4006_v42, %v1619_v59  ;;  %v2242_v36 = vadd.f32 %v4013_v31, %v1633_v19 }
 0x108   :  { %v2638_v37 = vcombine.low %v2629_v33, %v2636_v7  ;;  %v2240_v38 = vadd.f32 %v4027_v24, %v1636_v27  ;;  %v2243_v39 = vadd.f32 %v4023_v21, %v1635_v20  ;;  %v2335_v40 = vmax.f32 %v2237_v58, 0.0 }
 0x109   :  { %v2645_v44 = vrot.slane %v2637_v25, %v3571_v13  ;;  %v2244_v45 = vadd.f32 %v4033_v56, %v1637_v34  ;;  %v2336_v46 = vmax.f32 %v2238_v28, 0.0  ;;  %v2337_v23 = vmax.f32 %v2239_v29, 0.0 }
 0x10a   :  { %v2652_v48 = vrot.slane %v2638_v37, %v3571_v13  ;;  %v2338_v50 = vmax.f32 %v2240_v38, 0.0  ;;  %v2339_v35 = vmax.f32 %v2241_v2, 0.0  ;;  %v2340_v22 = vmax.f32 %v2242_v36, 0.0 }
 0x10b   :  { %v2341_v54 = vmax.f32 %v2243_v39, 0.0  ;;  %v2342_v55 = vmax.f32 %v2244_v45, 0.0  ;;  %v2654_v57 = vcombine.low %v2335_v40, %v2336_v46  ;;  %v1638_v60 = vcombine.high %v4060_v49, %v4060_v49 }
 0x10c   :  { %v2653_v62 = vcombine.low %v2645_v44, %v2652_v48  ;;  %v2655_v0 = vcombine.low %v2337_v23, %v2338_v50  ;;  %v2656_v1 = vcombine.low %v2339_v35, %v2340_v22  ;;  %v1645_v3 = vrot.slane %v4060_v49, %v3571_v13  ;;  %v4136_v5 = vpop.f32.mrf.mxu0 }
 0x10d   :  { %v2657_v17 = vcombine.low %v2341_v54, %v2342_v55  ;;  %v2664_v30 = vrot.slane %v2654_v57, %v3571_v13  ;;  %v1652_v6 = vrot.slane %v1638_v60, %v3571_v13  ;;  %v1687_v63 = vcombine.high %v4069_v4, %v4069_v4 }
 0x10e   :  { %3140 = vst.msk [vmem:[%s4402_s5 + $0x10] sm:$0xff] %vm3137_vm3, %v2653_v62  ;;  %v2671_v47 = vrot.slane %v2655_v0, %v3571_v13  ;;  %v2678_v18 = vrot.slane %v2656_v1, %v3571_v13  ;;  %v1653_v49 = vcombine.high %v1645_v3, %v1645_v3  ;;  %v1661_v61 = vrot.slane %v1645_v3, %v3571_v13  ;;  %v3423_v8 = vpop.f32.mrf.mxu0 }
 0x10f   :  { %v2685_v9 = vrot.slane %v2657_v17, %v3571_v13  ;;  %v1654_v10 = vcombine.high %v1652_v6, %v1652_v6  ;;  %v1668_v12 = vrot.slane %v1652_v6, %v3571_v13  ;;  %v1694_v59 = vrot.slane %v4069_v4, %v3571_v13 }
 0x110   :  { %v2686_v15 = vcombine.low %v2664_v30, %v2671_v47  ;;  %v1675_v33 = vrot.slane %v1653_v49, %v3571_v13  ;;  %v1683_v14 = vcombine.high %v1661_v61, %v1661_v61  ;;  %v2245_v52 = vadd.f32 %v4003_v41, %v1661_v61  ;;  %v4155_v11 = vpop.f32.mrf.mxu0 }
 0x111   :  { %v2687_v19 = vcombine.low %v2678_v18, %v2685_v9  ;;  %v1682_v20 = vrot.slane %v1654_v10, %v3571_v13  ;;  %v1684_v58 = vcombine.high %v1668_v12, %v1668_v12  ;;  %v2249_v7 = vadd.f32 %v4006_v42, %v1668_v12 }
 0x112   :  { %v2694_v27 = vrot.slane %v2686_v15, %v3571_v13  ;;  %v1685_v28 = vcombine.high %v1675_v33, %v1675_v33  ;;  %v2246_v29 = vadd.f32 %v4009_v43, %v1675_v33  ;;  %v2247_v4 = vadd.f32 %v4019_v51, %v1683_v14  ;;  %v3426_v32 = vpop.f32.mrf.mxu0 }
 0x113   :  { %v2701_v25 = vrot.slane %v2687_v19, %v3571_v13  ;;  %v1686_v34 = vcombine.high %v1682_v20, %v1682_v20  ;;  %v2250_v2 = vadd.f32 %v4013_v31, %v1682_v20  ;;  %v2251_v36 = vadd.f32 %v4023_v21, %v1684_v58 }
 0x114   :  { %v2248_v37 = vadd.f32 %v4027_v24, %v1685_v28  ;;  %v2343_v38 = vmax.f32 %v2245_v52, 0.0  ;;  %v2344_v39 = vmax.f32 %v2246_v29, 0.0  ;;  %v2345_v40 = vmax.f32 %v2247_v4, 0.0 }
 0x115   :  { %v2702_v44 = vcombine.low %v2694_v27, %v2701_v25  ;;  %v2252_v45 = vadd.f32 %v4033_v56, %v1686_v34  ;;  %v2347_v46 = vmax.f32 %v2249_v7, 0.0  ;;  %v2348_v23 = vmax.f32 %v2250_v2, 0.0 }
 0x116   :  { %v2346_v48 = vmax.f32 %v2248_v37, 0.0  ;;  %v2349_v50 = vmax.f32 %v2251_v36, 0.0  ;;  %v2703_v35 = vcombine.low %v2343_v38, %v2344_v39  ;;  %v1701_v22 = vrot.slane %v1687_v63, %v3571_v13 }
 0x117   :  { %3141 = vst.msk [vmem:[%s4402_s5 + $0x18] sm:$0xff] %vm3137_vm3, %v2702_v44  ;;  %v2350_v54 = vmax.f32 %v2252_v45, 0.0  ;;  %v2705_v55 = vcombine.low %v2347_v46, %v2348_v23  ;;  %v1702_v57 = vcombine.high %v1694_v59, %v1694_v59  ;;  %v1710_v60 = vrot.slane %v1694_v59, %v3571_v13 }
 0x118   :  { %v2704_v62 = vcombine.low %v2345_v40, %v2346_v48  ;;  %v2713_v0 = vrot.slane %v2703_v35, %v3571_v13  ;;  %v1703_v1 = vcombine.high %v1701_v22, %v1701_v22  ;;  %v1717_v3 = vrot.slane %v1701_v22, %v3571_v13 }
 0x119   :  { %v2706_v17 = vcombine.low %v2349_v50, %v2350_v54  ;;  %v2727_v30 = vrot.slane %v2705_v55, %v3571_v13  ;;  %v1724_v6 = vrot.slane %v1702_v57, %v3571_v13  ;;  %v1732_v63 = vcombine.high %v1710_v60, %v1710_v60  ;;  %v4177_v47 = vpop.f32.mrf.mxu0 }
 0x11a   :  { %v2720_v18 = vrot.slane %v2704_v62, %v3571_v13  ;;  %v1731_v49 = vrot.slane %v1703_v1, %v3571_v13  ;;  %v1733_v61 = vcombine.high %v1717_v3, %v1717_v3  ;;  %v2253_v8 = vadd.f32 %v4003_v41, %v1710_v60 }
 0x11b   :  { %v2734_v9 = vrot.slane %v2706_v17, %v3571_v13  ;;  %v1734_v10 = vcombine.high %v1724_v6, %v1724_v6  ;;  %v2254_v12 = vadd.f32 %v4009_v43, %v1724_v6  ;;  %v2255_v59 = vadd.f32 %v4019_v51, %v1732_v63  ;;  %v3429_v15 = vpop.f32.mrf.mxu0 }
 0x11c   :  { %v2735_v33 = vcombine.low %v2713_v0, %v2720_v18  ;;  %v1735_v14 = vcombine.high %v1731_v49, %v1731_v49  ;;  %v2257_v52 = vadd.f32 %v4006_v42, %v1717_v3  ;;  %v2258_v19 = vadd.f32 %v4013_v31, %v1731_v49 }
 0x11d   :  { %v2736_v20 = vcombine.low %v2727_v30, %v2734_v9  ;;  %v2256_v58 = vadd.f32 %v4027_v24, %v1734_v10  ;;  %v2259_v7 = vadd.f32 %v4023_v21, %v1733_v61  ;;  %v2351_v27 = vmax.f32 %v2253_v8, 0.0  ;;  %v4189_v28 = vpop.f32.mrf.mxu0 }
 0x11e   :  { %v2743_v29 = vrot.slane %v2735_v33, %v3571_v13  ;;  %v2260_v4 = vadd.f32 %v4033_v56, %v1735_v14  ;;  %v2352_v32 = vmax.f32 %v2254_v12, 0.0  ;;  %v2353_v25 = vmax.f32 %v2255_v59, 0.0 }
 0x11f   :  { %v2750_v34 = vrot.slane %v2736_v20, %v3571_v13  ;;  %v2354_v2 = vmax.f32 %v2256_v58, 0.0  ;;  %v2355_v36 = vmax.f32 %v2257_v52, 0.0  ;;  %v2356_v37 = vmax.f32 %v2258_v19, 0.0  ;;  %v3432_v38 = vpop.f32.mrf.mxu0 }
 0x120   :  { %v2357_v39 = vmax.f32 %v2259_v7, 0.0  ;;  %v2358_v40 = vmax.f32 %v2260_v4, 0.0  ;;  %v2752_v44 = vcombine.low %v2351_v27, %v2352_v32  ;;  %v1736_v45 = vcombine.high %v4083_v26, %v4083_v26 }
 0x121   :  { %v2751_v46 = vcombine.low %v2743_v29, %v2750_v34  ;;  %v2753_v23 = vcombine.low %v2353_v25, %v2354_v2  ;;  %v2754_v48 = vcombine.low %v2355_v36, %v2356_v37  ;;  %v1743_v50 = vrot.slane %v4083_v26, %v3571_v13 }
 0x122   :  { %v2755_v35 = vcombine.low %v2357_v39, %v2358_v40  ;;  %v2762_v22 = vrot.slane %v2752_v44, %v3571_v13  ;;  %v1750_v54 = vrot.slane %v1736_v45, %v3571_v13  ;;  %v1785_v55 = vcombine.high %v4103_v53, %v4103_v53 }
 0x123   :  { %3142 = vst.msk [vmem:[%s4402_s5 + $0x20] sm:$0xff] %vm3137_vm3, %v2751_v46  ;;  %v2769_v57 = vrot.slane %v2753_v23, %v3571_v13  ;;  %v2776_v60 = vrot.slane %v2754_v48, %v3571_v13  ;;  %v1751_v62 = vcombine.high %v1743_v50, %v1743_v50  ;;  %v1759_v26 = vrot.slane %v1743_v50, %v3571_v13 }
 0x124   :  { %v2783_v0 = vrot.slane %v2755_v35, %v3571_v13  ;;  %v1752_v1 = vcombine.high %v1750_v54, %v1750_v54  ;;  %v1766_v3 = vrot.slane %v1750_v54, %v3571_v13  ;;  %v1792_v17 = vrot.slane %v4103_v53, %v3571_v13 }
 0x125   :  { %v2784_v30 = vcombine.low %v2762_v22, %v2769_v57  ;;  %v1773_v6 = vrot.slane %v1751_v62, %v3571_v13  ;;  %v1781_v63 = vcombine.high %v1759_v26, %v1759_v26  ;;  %v2261_v18 = vadd.f32 %v4003_v41, %v1759_v26 }
 0x126   :  { %v2785_v49 = vcombine.low %v2776_v60, %v2783_v0  ;;  %v1780_v61 = vrot.slane %v1752_v1, %v3571_v13  ;;  %v1782_v8 = vcombine.high %v1766_v3, %v1766_v3  ;;  %v2265_v9 = vadd.f32 %v4027_v24, %v1766_v3  ;;  %v4220_v53 = vpop.f32.mrf.mxu1 }
 0x127   :  { %v2792_v10 = vrot.slane %v2784_v30, %v3571_v13  ;;  %v1783_v12 = vcombine.high %v1773_v6, %v1773_v6  ;;  %v2262_v59 = vadd.f32 %v4003_v41, %v1773_v6  ;;  %v2263_v15 = vadd.f32 %v4009_v43, %v1781_v63 }
 0x128   :  { %v2799_v33 = vrot.slane %v2785_v49, %v3571_v13  ;;  %v1784_v14 = vcombine.high %v1780_v61, %v1780_v61  ;;  %v2266_v52 = vadd.f32 %v4006_v42, %v1780_v61  ;;  %v2267_v19 = vadd.f32 %v4013_v31, %v1782_v8  ;;  %v3467_v29 = vpop.f32.mrf.mxu1 }
 0x129   :  { %v2264_v20 = vadd.f32 %v4019_v51, %v1783_v12  ;;  %v2359_v58 = vmax.f32 %v2261_v18, 0.0  ;;  %v2360_v7 = vmax.f32 %v2262_v59, 0.0  ;;  %v2361_v27 = vmax.f32 %v2263_v15, 0.0 }
 0x12a   :  { %v2800_v4 = vcombine.low %v2792_v10, %v2799_v33  ;;  %v2363_v32 = vmax.f32 %v2265_v9, 0.0  ;;  %v2364_v25 = vmax.f32 %v2266_v52, 0.0  ;;  %v2365_v34 = vmax.f32 %v2267_v19, 0.0 }
 0x12b   :  { %v2362_v2 = vmax.f32 %v2264_v20, 0.0  ;;  %v2807_v36 = vrot.slane %v2359_v58, %v3571_v13  ;;  %v2815_v37 = vcombine.low %v2360_v7, %v2361_v27  ;;  %v1799_v38 = vrot.slane %v1785_v55, %v3571_v13 }
 0x12c   :  { %3143 = vst.msk [vmem:[%s4402_s5 + $0x28] sm:$0xff] %vm3137_vm3, %v2800_v4  ;;  %v1800_v39 = vcombine.high %v1792_v17, %v1792_v17  ;;  %v1808_v40 = vrot.slane %v1792_v17, %v3571_v13  ;;  %v2268_v44 = vadd.f32 %v4023_v21, %v1784_v14  ;;  %v2817_v23 = vcombine.low %v2364_v25, %v2365_v34 }
 0x12d   :  { %v2814_v45 = vrot.slane %v2807_v36, %v3571_v13  ;;  %v2816_v46 = vcombine.low %v2362_v2, %v2363_v32  ;;  %v1801_v48 = vcombine.high %v1799_v38, %v1799_v38  ;;  %v1815_v50 = vrot.slane %v1799_v38, %v3571_v13 }
 0x12e   :  { %v1822_v35 = vrot.slane %v1800_v39, %v3571_v13  ;;  %v1830_v22 = vcombine.high %v1808_v40, %v1808_v40  ;;  %v2269_v54 = vadd.f32 %v4033_v56, %v1808_v40  ;;  %v2825_v55 = vrot.slane %v2815_v37, %v3571_v13 }
 0x12f   :  { %v2832_v57 = vrot.slane %v2816_v46, %v3571_v13  ;;  %3145 = vst.msk [vmem:[%s4402_s5 + $0x30] sm:$0x1] %vm3144_vm4, %v2814_v45  ;;  %v1829_v60 = vrot.slane %v1801_v48, %v3571_v13  ;;  %v2366_v62 = vmax.f32 %v2268_v44, 0.0  ;;  %v1831_v26 = vcombine.high %v1815_v50, %v1815_v50 }
 0x130   :  { %v1832_v0 = vcombine.high %v1822_v35, %v1822_v35  ;;  %v2270_v1 = vadd.f32 %v4003_v41, %v1822_v35  ;;  %v2271_v3 = vadd.f32 %v4009_v43, %v1830_v22  ;;  %v2273_v6 = vadd.f32 %v4027_v24, %v1815_v50 }
 0x131   :  { %v2847_v17 = vcombine.low %v2825_v55, %v2832_v57  ;;  %v1833_v30 = vcombine.high %v1829_v60, %v1829_v60  ;;  %v2274_v63 = vadd.f32 %v4006_v42, %v1829_v60  ;;  %v2275_v49 = vadd.f32 %v4013_v31, %v1831_v26 }
 0x132   :  { %v2272_v18 = vadd.f32 %v4019_v51, %v1832_v0  ;;  %v2367_v61 = vmax.f32 %v2269_v54, 0.0  ;;  %v2368_v8 = vmax.f32 %v2270_v1, 0.0  ;;  %v2369_v9 = vmax.f32 %v2271_v3, 0.0 }
 0x133   :  { %v2371_v10 = vmax.f32 %v2273_v6, 0.0  ;;  %v2372_v12 = vmax.f32 %v2274_v63, 0.0  ;;  %v2839_v59 = vrot.slane %v2817_v23, %v3571_v13  ;;  %v2373_v33 = vmax.f32 %v2275_v49, 0.0 }
 0x134   :  { %v2370_v15 = vmax.f32 %v2272_v18, 0.0  ;;  %v2818_v14 = vcombine.low %v2366_v62, %v2367_v61  ;;  %v1834_v52 = vcombine.high %v4117_v16, %v4117_v16  ;;  %v2855_v19 = vrot.slane %v2847_v17, %v3571_v13 }
 0x135   :  { %v2864_v20 = vcombine.low %v2368_v8, %v2369_v9  ;;  %v1841_v58 = vrot.slane %v4117_v16, %v3571_v13  ;;  %v2276_v7 = vadd.f32 %v4023_v21, %v1833_v30  ;;  %v1883_v32 = vcombine.high %v4136_v5, %v4136_v5 }
 0x136   :  { %v2846_v27 = vrot.slane %v2818_v14, %v3571_v13  ;;  %v2865_v29 = vcombine.low %v2370_v15, %v2371_v10  ;;  %v1848_v4 = vrot.slane %v1834_v52, %v3571_v13  ;;  %v2866_v25 = vcombine.low %v2372_v12, %v2373_v33 }
 0x137   :  { %v2874_v34 = vrot.slane %v2864_v20, %v3571_v13  ;;  %v1849_v2 = vcombine.high %v1841_v58, %v1841_v58  ;;  %v1857_v36 = vrot.slane %v1841_v58, %v3571_v13  ;;  %v2374_v46 = vmax.f32 %v2276_v7, 0.0 }
 0x138   :  { %v2848_v37 = vcombine.low %v2839_v59, %v2846_v27  ;;  %v2881_v38 = vrot.slane %v2865_v29, %v3571_v13  ;;  %v1850_v16 = vcombine.high %v1848_v4, %v1848_v4  ;;  %v1864_v39 = vrot.slane %v1848_v4, %v3571_v13 }
 0x139   :  { %v1871_v40 = vrot.slane %v1849_v2, %v3571_v13  ;;  %v1879_v44 = vcombine.high %v1857_v36, %v1857_v36  ;;  %v2277_v45 = vadd.f32 %v4033_v56, %v1857_v36  ;;  %v2888_v0 = vrot.slane %v2866_v25, %v3571_v13 }
 0x13a   :  { %v2862_v23 = vrot.slane %v2848_v37, %v3571_v13  ;;  %v2896_v48 = vcombine.low %v2874_v34, %v2881_v38  ;;  %v1878_v50 = vrot.slane %v1850_v16, %v3571_v13  ;;  %v1880_v35 = vcombine.high %v1864_v39, %v1864_v39 }
 0x13b   :  { %v1881_v22 = vcombine.high %v1871_v40, %v1871_v40  ;;  %v2278_v54 = vadd.f32 %v4003_v41, %v1871_v40  ;;  %v2279_v55 = vadd.f32 %v4009_v43, %v1879_v44  ;;  %v2281_v57 = vadd.f32 %v4027_v24, %v1864_v39 }
 0x13c   :  { %v2863_v60 = vcombine.low %v2855_v19, %v2862_v23  ;;  %v1882_v62 = vcombine.high %v1878_v50, %v1878_v50  ;;  %v2282_v26 = vadd.f32 %v4006_v42, %v1878_v50  ;;  %v2283_v3 = vadd.f32 %v4013_v31, %v1880_v35 }
 0x13d   :  { %v2280_v1 = vadd.f32 %v4019_v51, %v1881_v22  ;;  %v2375_v17 = vmax.f32 %v2277_v45, 0.0  ;;  %v2376_v30 = vmax.f32 %v2278_v54, 0.0  ;;  %v2904_v6 = vrot.slane %v2896_v48, %v3571_v13 }
 0x13e   :  { %3146 = vst.msk [vmem:[%s4402_s5 + $0x38] sm:$0xff] %vm3137_vm3, %v2863_v60  ;;  %v2377_v63 = vmax.f32 %v2279_v55, 0.0  ;;  %v2379_v18 = vmax.f32 %v2281_v57, 0.0  ;;  %v1890_v49 = vrot.slane %v4136_v5, %v3571_v13  ;;  %v2380_v8 = vmax.f32 %v2282_v26, 0.0 }
 0x13f   :  { %v2378_v61 = vmax.f32 %v2280_v1, 0.0  ;;  %v2867_v9 = vcombine.low %v2374_v46, %v2375_v17  ;;  %v1897_v10 = vrot.slane %v1883_v32, %v3571_v13  ;;  %v2381_v12 = vmax.f32 %v2283_v3, 0.0 }
 0x140   :  { %v2913_v59 = vcombine.low %v2376_v30, %v2377_v63  ;;  %v1898_v15 = vcombine.high %v1890_v49, %v1890_v49  ;;  %v1906_v33 = vrot.slane %v1890_v49, %v3571_v13  ;;  %v2284_v20 = vadd.f32 %v4023_v21, %v1882_v62 }
 0x141   :  { %v2895_v14 = vrot.slane %v2867_v9, %v3571_v13  ;;  %v2914_v52 = vcombine.low %v2378_v61, %v2379_v18  ;;  %v1899_v19 = vcombine.high %v1897_v10, %v1897_v10  ;;  %v1913_v5 = vrot.slane %v1897_v10, %v3571_v13 }
 0x142   :  { %v2923_v58 = vrot.slane %v2913_v59, %v3571_v13  ;;  %v1920_v7 = vrot.slane %v1898_v15, %v3571_v13  ;;  %v1928_v27 = vcombine.high %v1906_v33, %v1906_v33  ;;  %v2285_v25 = vadd.f32 %v4033_v56, %v1906_v33 }
 0x143   :  { %v2897_v29 = vcombine.low %v2888_v0, %v2895_v14  ;;  %v2930_v4 = vrot.slane %v2914_v52, %v3571_v13  ;;  %v1927_v32 = vrot.slane %v1899_v19, %v3571_v13  ;;  %v1929_v34 = vcombine.high %v1913_v5, %v1913_v5 }
 0x144   :  { %v1930_v2 = vcombine.high %v1920_v7, %v1920_v7  ;;  %v2286_v36 = vadd.f32 %v4003_v41, %v1920_v7  ;;  %v2287_v37 = vadd.f32 %v4009_v43, %v1928_v27  ;;  %v2289_v40 = vadd.f32 %v4027_v24, %v1913_v5 }
 0x145   :  { %v2911_v38 = vrot.slane %v2897_v29, %v3571_v13  ;;  %v2945_v16 = vcombine.low %v2923_v58, %v2930_v4  ;;  %v1931_v39 = vcombine.high %v1927_v32, %v1927_v32  ;;  %v2290_v45 = vadd.f32 %v4006_v42, %v1927_v32 }
 0x146   :  { %v2288_v44 = vadd.f32 %v4019_v51, %v1930_v2  ;;  %v2291_v46 = vadd.f32 %v4013_v31, %v1929_v34  ;;  %v2382_v23 = vmax.f32 %v2284_v20, 0.0  ;;  %v2915_v50 = vcombine.low %v2380_v8, %v2381_v12 }
 0x147   :  { %v2912_v48 = vcombine.low %v2904_v6, %v2911_v38  ;;  %v2383_v35 = vmax.f32 %v2285_v25, 0.0  ;;  %v2384_v22 = vmax.f32 %v2286_v36, 0.0  ;;  %v2385_v54 = vmax.f32 %v2287_v37, 0.0 }
 0x148   :  { %v2386_v55 = vmax.f32 %v2288_v44, 0.0  ;;  %v2387_v57 = vmax.f32 %v2289_v40, 0.0  ;;  %v2388_v60 = vmax.f32 %v2290_v45, 0.0  ;;  %v2953_v62 = vrot.slane %v2945_v16, %v3571_v13 }
 0x149   :  { %3147 = vst.msk [vmem:[%s4402_s5 + $0x40] sm:$0xff] %vm3137_vm3, %v2912_v48  ;;  %v2389_v26 = vmax.f32 %v2291_v46, 0.0  ;;  %v2916_v0 = vcombine.low %v2382_v23, %v2383_v35  ;;  %v1932_v1 = vcombine.high %v4155_v11, %v4155_v11  ;;  %v2962_v3 = vcombine.low %v2384_v22, %v2385_v54 }
 0x14a   :  { %v2963_v17 = vcombine.low %v2386_v55, %v2387_v57  ;;  %v1939_v30 = vrot.slane %v4155_v11, %v3571_v13  ;;  %v2292_v6 = vadd.f32 %v4023_v21, %v1931_v39  ;;  %v2937_v63 = vrot.slane %v2915_v50, %v3571_v13 }
 0x14b   :  { %v2944_v18 = vrot.slane %v2916_v0, %v3571_v13  ;;  %v2964_v49 = vcombine.low %v2388_v60, %v2389_v26  ;;  %v1946_v61 = vrot.slane %v1932_v1, %v3571_v13  ;;  %v1981_v12 = vcombine.high %v4177_v47, %v4177_v47 }
 0x14c   :  { %v2979_v8 = vrot.slane %v2963_v17, %v3571_v13  ;;  %v1947_v9 = vcombine.high %v1939_v30, %v1939_v30  ;;  %v1955_v10 = vrot.slane %v1939_v30, %v3571_v13  ;;  %v2972_v11 = vrot.slane %v2962_v3, %v3571_v13 }
 0x14d   :  { %v2946_v59 = vcombine.low %v2937_v63, %v2944_v18  ;;  %v1948_v15 = vcombine.high %v1946_v61, %v1946_v61  ;;  %v1962_v33 = vrot.slane %v1946_v61, %v3571_v13  ;;  %v2390_v20 = vmax.f32 %v2292_v6, 0.0 }
 0x14e   :  { %v1969_v14 = vrot.slane %v1947_v9, %v3571_v13  ;;  %v1977_v52 = vcombine.high %v1955_v10, %v1955_v10  ;;  %v2293_v19 = vadd.f32 %v4033_v56, %v1955_v10  ;;  %v2994_v5 = vcombine.low %v2972_v11, %v2979_v8 }
 0x14f   :  { %v2960_v58 = vrot.slane %v2946_v59, %v3571_v13  ;;  %v1976_v7 = vrot.slane %v1948_v15, %v3571_v13  ;;  %v1978_v27 = vcombine.high %v1962_v33, %v1962_v33  ;;  %v2297_v25 = vadd.f32 %v4027_v24, %v1962_v33 }
 0x150   :  { %v1979_v29 = vcombine.high %v1969_v14, %v1969_v14  ;;  %v2294_v4 = vadd.f32 %v4003_v41, %v1969_v14  ;;  %v2295_v32 = vadd.f32 %v4009_v43, %v1977_v52  ;;  %v2391_v16 = vmax.f32 %v2293_v19, 0.0 }
 0x151   :  { %v2961_v34 = vcombine.low %v2953_v62, %v2960_v58  ;;  %v1980_v2 = vcombine.high %v1976_v7, %v1976_v7  ;;  %v2298_v36 = vadd.f32 %v4006_v42, %v1976_v7  ;;  %v2299_v37 = vadd.f32 %v4013_v31, %v1978_v27 }
 0x152   :  { %v2296_v38 = vadd.f32 %v4019_v51, %v1979_v29  ;;  %v2392_v39 = vmax.f32 %v2294_v4, 0.0  ;;  %v2393_v40 = vmax.f32 %v2295_v32, 0.0  ;;  %v2965_v23 = vcombine.low %v2390_v20, %v2391_v16  ;;  %v3315_v29 = vld [vmem:[%s4401_s4] ss:$0 sm:$0xff]  ;;  %s3484_s4 = scalar_lea.vmem %s3293_s13, 32 }
 0x153   :  { %3148 = vst.msk [vmem:[%s4402_s5 + $0x48] sm:$0xff] %vm3137_vm3, %v2961_v34  ;;  %v2396_v44 = vmax.f32 %v2298_v36, 0.0  ;;  %v2397_v45 = vmax.f32 %v2299_v37, 0.0  ;;  %v1988_v50 = vrot.slane %v4177_v47, %v3571_v13  ;;  %v3002_v35 = vrot.slane %v2994_v5, %v3571_v13  ;;  %p3485_p0 = scmp.ne.s32.totalorder %s3293_s13, %s3484_s4  ;;  %p3490_p2 = scmp.lt.s32.totalorder %s3484_s4, %s3484_s4 }
 0x154   :  { %v2394_v46 = vmax.f32 %v2296_v38, 0.0  ;;  %v3011_v48 = vcombine.low %v2392_v39, %v2393_v40  ;;  %v2395_v22 = vmax.f32 %v2297_v25, 0.0  ;;  %v2986_v54 = vrot.slane %v2964_v49, %v3571_v13 }
 0x155   :  { %v1995_v55 = vrot.slane %v1981_v12, %v3571_v13  ;;  %v2993_v57 = vrot.slane %v2965_v23, %v3571_v13  ;;  %v3013_v60 = vcombine.low %v2396_v44, %v2397_v45  ;;  %v1996_v62 = vcombine.high %v1988_v50, %v1988_v50  ;;  %p3491_p3 = por %p3490_p2, %p3489_p1 }
 0x156   :  { %v2300_v26 = vadd.f32 %v4023_v21, %v1980_v2  ;;  %v2004_v1 = vrot.slane %v1988_v50, %v3571_v13  ;;  %v2036_v47 = vrot.slane %v4189_v28, %v3571_v13  ;;  %v3012_v30 = vcombine.low %v2394_v46, %v2395_v22 }
 0x157   :  { %v1997_v0 = vcombine.high %v1995_v55, %v1995_v55  ;;  %v2011_v3 = vrot.slane %v1995_v55, %v3571_v13  ;;  %v2995_v17 = vcombine.low %v2986_v54, %v2993_v57  ;;  %v3021_v6 = vrot.slane %v3011_v48, %v3571_v13  ;;  %p3492_p4 = pnand %p3491_p3, %p3485_p0 }
 0x158   :  { %v2018_v63 = vrot.slane %v1996_v62, %v3571_v13  ;;  %v2026_v49 = vcombine.high %v2004_v1, %v2004_v1  ;;  %v2301_v8 = vadd.f32 %v4033_v56, %v2004_v1  ;;  %v2398_v59 = vmax.f32 %v2300_v26, 0.0 }
 0x159   :  { %v2025_v18 = vrot.slane %v1997_v0, %v3571_v13  ;;  %v2027_v61 = vcombine.high %v2011_v3, %v2011_v3  ;;  %v3009_v9 = vrot.slane %v2995_v17, %v3571_v13  ;;  %v2305_v15 = vadd.f32 %v4027_v24, %v2011_v3 }
 0x15a   :  { %v2028_v10 = vcombine.high %v2018_v63, %v2018_v63  ;;  %v2302_v12 = vadd.f32 %v4003_v41, %v2018_v63  ;;  %v2303_v28 = vadd.f32 %v4009_v43, %v2026_v49  ;;  %v3028_v52 = vrot.slane %v3012_v30, %v3571_v13 }
 0x15b   :  { %v2029_v11 = vcombine.high %v2025_v18, %v2025_v18  ;;  %v2306_v33 = vadd.f32 %v4006_v42, %v2025_v18  ;;  %v3010_v14 = vcombine.low %v3002_v35, %v3009_v9  ;;  %v2307_v20 = vadd.f32 %v4013_v31, %v2027_v61 }
 0x15c   :  { %v2304_v19 = vadd.f32 %v4019_v51, %v2028_v10  ;;  %v2399_v58 = vmax.f32 %v2301_v8, 0.0  ;;  %v2400_v5 = vmax.f32 %v2302_v12, 0.0  ;;  %v2401_v7 = vmax.f32 %v2303_v28, 0.0 }
 0x15d   :  { %v2403_v27 = vmax.f32 %v2305_v15, 0.0  ;;  %3149 = vst.msk [vmem:[%s4402_s5 + $0x50] sm:$0xff] %vm3137_vm3, %v3010_v14  ;;  %v2404_v43 = vmax.f32 %v2306_v33, 0.0  ;;  %v2405_v24 = vmax.f32 %v2307_v20, 0.0  ;;  %v2037_v4 = vcombine.high %v2036_v47, %v2036_v47 }
 0x15e   :  { %v2402_v42 = vmax.f32 %v2304_v19, 0.0  ;;  %v3014_v51 = vcombine.low %v2398_v59, %v2399_v58  ;;  %v3035_v31 = vrot.slane %v3013_v60, %v3571_v13  ;;  %v2044_v32 = vrot.slane %v2036_v47, %v3571_v13 }
 0x15f   :  { %v2308_v25 = vadd.f32 %v4023_v21, %v2029_v11  ;;  %v3043_v34 = vcombine.low %v3021_v6, %v3028_v52  ;;  %v2051_v36 = vrot.slane %v2037_v4, %v3571_v13  ;;  %v3278_v37 = vadd.f32 %v3315_v29, %v4220_v53 }
 0x160   :  { %v3061_v2 = vcombine.low %v2402_v42, %v2403_v27  ;;  %v3042_v38 = vrot.slane %v3014_v51, %v3571_v13  ;;  %v3060_v16 = vcombine.low %v2400_v5, %v2401_v7  ;;  %v2309_v39 = vadd.f32 %v4033_v56, %v2044_v32 }
 0x161   :  { %v2406_v40 = vmax.f32 %v2308_v25, 0.0  ;;  %v3062_v44 = vcombine.low %v2404_v43, %v2405_v24  ;;  %v2310_v45 = vadd.f32 %v4003_v41, %v2051_v36  ;;  %v3281_v46 = vmax.f32 %v3278_v37, 0.0 }
 0x162   :  { %v3044_v21 = vcombine.low %v3035_v31, %v3042_v38  ;;  %v3077_v23 = vrot.slane %v3061_v2, %v3571_v13  ;;  %v2407_v48 = vmax.f32 %v2309_v39, 0.0  ;;  %v3051_v53 = vrot.slane %v3043_v34, %v3571_v13 }
 0x163   :  { %v2408_v50 = vmax.f32 %v2310_v45, 0.0  ;;  %3283 = vst.msk [vmem:[#allocation2] sm:$0x3] %vm3282_vm5, %v3281_v46  ;;  %v3070_v22 = vrot.slane %v3060_v16, %v3571_v13 }
 0x164   :  { %v3058_v35 = vrot.slane %v3044_v21, %v3571_v13  ;;  %v3063_v56 = vcombine.low %v2406_v40, %v2407_v48 }
 0x165   :  { %3495 = shalt.err (!%p3492_p4)
}
 0x166   :  { %3295 = dma.vmem_to_hbm [thread:$0]  %s3293_s13, 32, %s4403_s6, [#allocation3]   ;;  %v3115_v41 = vrot.slane %v2408_v50, %v3571_v13  ;;  %v3059_v54 = vcombine.low %v3051_v53, %v3058_v35  ;;  %v3092_v55 = vcombine.low %v3070_v22, %v3077_v23  ;;  %v3084_v57 = vrot.slane %v3062_v44, %v3571_v13 }
 0x167   :  { %v3091_v60 = vrot.slane %v3063_v56, %v3571_v13 }
 0x168   :  { %v3122_v62 = vrot.slane %v3115_v41, %v3571_v13  ;;  %3150 = vst.msk [vmem:[%s4402_s5 + $0x58] sm:$0xff] %vm3137_vm3, %v3059_v54  ;;  %v3100_v0 = vrot.slane %v3092_v55, %v3571_v13 }
 0x169   :  { %v3093_v26 = vcombine.low %v3084_v57, %v3091_v60 }
 0x16a   :  { %3152 = vst.msk [vmem:[%s4402_s5 + $0x68] sm:$0x1] %vm3144_vm4, %v3122_v62 }
 0x16b   :  { %v3107_v1 = vrot.slane %v3093_v26, %v3571_v13 }
 0x16d   :  { %v3108_v3 = vcombine.low %v3100_v0, %v3107_v1 }
 0x16f   :  { %3151 = vst.msk [vmem:[%s4402_s5 + $0x60] sm:$0xff] %vm3137_vm3, %v3108_v3 }
 0x170   :  { %3504 = dma.done.wait [#allocation3], 32  }
 0x171   :  { %3505 = vsyncadd [#allocation3], 4294967264 }
 0x172   :  { %3301 = vsyncpa [#allocation3], 1 }

</bundles_post_ra>
